<compile_context>
chip_gen: v6e
topology: v6e:2x2x1
jax: 0.10.0
libtpu: 0.0.40
codegen_flags: <defaults>
</compile_context>

<pallas_src>
import jax
import jax.numpy as jnp
import numpy as np
from jax.experimental import pallas as pl
from jax.experimental.pallas import tpu as pltpu


def _round_up(x: int, m: int) -> int:
    return ((x + m - 1) // m) * m


def _make_kernel(S: int, B: int, Bp: int, E: int, P: int):
    """Fused gather + bidirectional-GRU + temporal-max + linear kernel.

    Lane layout: each gate (r, z, n) occupies its own 128-wide lane block of
    width P; within a block, lanes [0:H] are the forward direction, [H:2H] the
    backward direction, [2H:P] zero padding (padding stays exactly 0 through
    the recurrence because the padded weight columns/rows are zero).
    Batch is padded to Bp=8 sublanes; padded rows are independent garbage that
    is sliced away in the wrapper.
    """

    def kernel(tok_ref,      # SMEM (B*S,) int32, index = b*S + t
               emb_ref,      # VMEM (V, E)   f32 embedding table
               w2_ref,       # VMEM (2E, 3P) bf16  [W_ih_fwd ; W_ih_bwd] (K-concat)
               bi_ref,       # VMEM (1, 3P)  f32   folded b_ih (+ b_hh for r,z)
               whh_ref,      # VMEM (P, 3P)  bf16  block-diagonal fused W_hh
               bhn_ref,      # VMEM (1, P)   f32   b_hh for the n gate
               wfc_ref,      # VMEM (P, CP)  bf16  fc1 weight (zero-padded)
               bfc_ref,      # VMEM (1, CP)  f32   fc1 bias (zero-padded)
               out_ref,      # VMEM (Bp, CP) f32   lane-dense output
               x_scratch,    # VMEM (S*Bp, 2E) f32 gathered [x_t | x_{S-1-t}]
               gx_scratch):  # VMEM (S*Bp, 3P) f32 staged input-gate projections
        # ---- in-kernel embedding gather, directly into the K-concatenated
        # time-major layout (batch padded to the 8-sublane tile) ----
        x_scratch[...] = jnp.zeros_like(x_scratch)
        for t in range(S):
            for b in range(B):
                row = t * Bp + b
                tf = tok_ref[b * S + t]              # fwd direction token at t
                tb = tok_ref[b * S + (S - 1 - t)]    # bwd direction token at t
                x_scratch[pl.ds(row, 1), 0:E] = emb_ref[pl.ds(tf, 1), :]
                x_scratch[pl.ds(row, 1), E:2 * E] = emb_ref[pl.ds(tb, 1), :]

        # ---- ONE fused input projection for all timesteps & both directions
        # (biases folded), staged to VMEM so per-step reads are aligned tiles.
        xcat = x_scratch[...].astype(jnp.bfloat16)                    # (S*Bp, 2E)
        gx_scratch[...] = (jnp.dot(xcat, w2_ref[...],
                                   preferred_element_type=jnp.float32)
                           + bi_ref[...])                             # (S*Bp, 3P)

        # Hoisted broadcast (JAX does not CSE broadcast_in_dim inside loops).
        bhn = jnp.broadcast_to(bhn_ref[...], (Bp, P))

        h = jnp.zeros((Bp, P), jnp.float32)          # [h_fwd | h_bwd | 0]
        m = jnp.full((Bp, P), -1e30, jnp.float32)    # running max over time

        # Static unroll: S is small; all slices below are static and tile-aligned.
        for t in range(S):
            gx = gx_scratch[t * Bp:(t + 1) * Bp, :]                   # (Bp, 3P)
            # whh_ref indexed inside the loop (not held live across the unroll).
            gh = jnp.dot(h.astype(jnp.bfloat16), whh_ref[...],
                         preferred_element_type=jnp.float32)          # (Bp, 3P)

            r = jax.nn.sigmoid(gx[:, 0:P] + gh[:, 0:P])
            z = jax.nn.sigmoid(gx[:, P:2 * P] + gh[:, P:2 * P])
            n = jnp.tanh(gx[:, 2 * P:3 * P] + r * (gh[:, 2 * P:3 * P] + bhn))
            h = (1.0 - z) * n + z * h
            # max over time of concat([fwd, bwd]) == per-lane running max
            # (both directions live in disjoint lanes of h).
            m = jnp.maximum(m, h)

        # fc1 on the packed max-state; padded rows/cols of wfc are zero.
        out_ref[...] = (jnp.dot(m.astype(jnp.bfloat16), wfc_ref[...],
                                preferred_element_type=jnp.float32)
                        + bfc_ref[...])

    return kernel


def _pack_params(gru_params, fc_params, H, C, P, CP):
    """Build lane-padded / fused weights (gate order r=0, z=1, n=2).

    MXU operands are cast to bf16; biases stay f32 (all gate math is f32)."""
    wihf, bihf, whhf, bhhf, wihb, bihb, whhb, bhhb = gru_params
    wfc, bfc = fc_params
    E = wihf.shape[0]

    def lanes(g, d):  # lane slice for gate g, direction d (0=fwd, 1=bwd)
        s = g * P + d * H
        return slice(s, s + H)

    w2 = jnp.zeros((2 * E, 3 * P), jnp.float32)   # [W_ih_fwd ; W_ih_bwd]
    whh = jnp.zeros((P, 3 * P), jnp.float32)
    bi = jnp.zeros((1, 3 * P), jnp.float32)
    bhn = jnp.zeros((1, P), jnp.float32)

    for g in range(3):
        gs = slice(g * H, (g + 1) * H)
        w2 = w2.at[0:E, lanes(g, 0)].set(wihf[:, gs])
        w2 = w2.at[E:2 * E, lanes(g, 1)].set(wihb[:, gs])
        whh = whh.at[0:H, lanes(g, 0)].set(whhf[:, gs])
        whh = whh.at[H:2 * H, lanes(g, 1)].set(whhb[:, gs])
        bf = bihf[:, gs]
        bb = bihb[:, gs]
        if g < 2:  # r, z: b_hh is purely additive -> fold into the one-shot gx
            bf = bf + bhhf[:, gs]
            bb = bb + bhhb[:, gs]
        bi = bi.at[:, lanes(g, 0)].set(bf)
        bi = bi.at[:, lanes(g, 1)].set(bb)

    # n gate's b_hh stays inside r*(h@W_hn + b_hn)
    bhn = bhn.at[:, 0:H].set(bhhf[:, 2 * H:3 * H])
    bhn = bhn.at[:, H:2 * H].set(bhhb[:, 2 * H:3 * H])

    wfc_p = jnp.zeros((P, CP), jnp.float32).at[0:2 * H, 0:C].set(wfc)
    bfc_p = jnp.zeros((1, CP), jnp.float32).at[:, 0:C].set(bfc)

    return (w2.astype(jnp.bfloat16), bi, whh.astype(jnp.bfloat16),
            bhn, wfc_p.astype(jnp.bfloat16), bfc_p)


@jax.jit
def seq_classifier_forward(tokens, embeddings, gru_params, fc_params):
    """JAX wrapper: packs parameters, then one fused Pallas kernel call."""
    wihf, bihf, whhf, bhhf, wihb, bihb, whhb, bhhb = gru_params
    wfc, bfc = fc_params

    B, S = tokens.shape
    V, E = embeddings.shape
    H = whhf.shape[0]
    C = wfc.shape[1]
    P = max(128, _round_up(2 * H, 128))     # fused per-gate lane block width
    CP = max(128, _round_up(C, 128))        # lane-dense output width
    Bp = _round_up(max(B, 8), 8)            # batch padded to the sublane tile
    assert 2 * H <= P

    packed = _pack_params(gru_params, fc_params, H, C, P, CP)
    tok_flat = tokens.reshape(-1).astype(jnp.int32)   # (B*S,), index = b*S + t
    emb = embeddings.astype(jnp.float32)

    vmem = pl.BlockSpec(memory_space=pltpu.MemorySpace.VMEM)
    kernel = _make_kernel(S, B, Bp, E, P)

    out_padded = pl.pallas_call(
        kernel,
        out_shape=jax.ShapeDtypeStruct((Bp, CP), jnp.float32),
        grid_spec=pltpu.PrefetchScalarGridSpec(
            num_scalar_prefetch=1,            # tokens -> SMEM
            grid=(),
            in_specs=[vmem] * 7,              # emb, w2, bi, whh, bhn, wfc, bfc
            out_specs=vmem,
            scratch_shapes=[pltpu.VMEM((S * Bp, 2 * E), jnp.float32),
                            pltpu.VMEM((S * Bp, 3 * P), jnp.float32)]),
    )(tok_flat, emb, *packed)

    return out_padded[:B, :C]


def seq_classifier_reference(tokens, embeddings, gru_params, fc_params):
    """Pure-JAX reference matching torch.nn.GRU(bidirectional=True) semantics."""
    wihf, bihf, whhf, bhhf, wihb, bihb, whhb, bhhb = gru_params
    wfc, bfc = fc_params
    H = whhf.shape[0]
    x = embeddings[tokens].astype(jnp.float32)   # (B, S, E)
    B, S, _ = x.shape

    def run_dir(wih, bih, whh, bhh, reverse):
        h = jnp.zeros((B, H), jnp.float32)
        hs = []
        ts = range(S - 1, -1, -1) if reverse else range(S)
        for t in ts:
            gx = x[:, t, :] @ wih + bih
            gh = h @ whh + bhh
            r = jax.nn.sigmoid(gx[:, :H] + gh[:, :H])
            z = jax.nn.sigmoid(gx[:, H:2 * H] + gh[:, H:2 * H])
            n = jnp.tanh(gx[:, 2 * H:] + r * gh[:, 2 * H:])
            h = (1.0 - z) * n + z * h
            hs.append(h)
        if reverse:
            hs = hs[::-1]
        return jnp.stack(hs, axis=1)             # (B, S, H)

    hf = run_dir(wihf, bihf, whhf, bhhf, False)
    hb = run_dir(wihb, bihb, whhb, bhhb, True)
    out_seq = jnp.concatenate([hf, hb], axis=-1)  # (B, S, 2H)
    feat = out_seq.max(axis=1)                    # max over time (dim=1)
    return feat @ wfc + bfc


if __name__ == "__main__":
    # Small, deterministic configuration.
    V, E, H, C = 50, 32, 32, 16      # vocab, embed dim, hidden_size, num_class
    B, S = 2, 8                      # batch, sequence length

    key = jax.random.PRNGKey(0)
    ks = jax.random.split(key, 12)

    embeddings = jax.random.normal(ks[0], (V, E), jnp.float32)

    gru_bound = 1.0 / np.sqrt(H)

    def u(k, shape, bound):
        return jax.random.uniform(k, shape, jnp.float32, -bound, bound)

    # GRU params (already transposed for `x @ W`): gate order r, z, n.
    wihf = u(ks[1], (E, 3 * H), gru_bound); bihf = u(ks[2], (1, 3 * H), gru_bound)
    whhf = u(ks[3], (H, 3 * H), gru_bound); bhhf = u(ks[4], (1, 3 * H), gru_bound)
    wihb = u(ks[5], (E, 3 * H), gru_bound); bihb = u(ks[6], (1, 3 * H), gru_bound)
    whhb = u(ks[7], (H, 3 * H), gru_bound); bhhb = u(ks[8], (1, 3 * H), gru_bound)

    fc_bound = 1.0 / np.sqrt(2 * H)
    wfc = u(ks[9], (2 * H, C), fc_bound)    # fc1: Linear(2H, C), weight pre-transposed
    bfc = u(ks[10], (1, C), fc_bound)

    tokens = jax.random.randint(ks[11], (B, S), 0, V, dtype=jnp.int32)

    gru_params = (wihf, bihf, whhf, bhhf, wihb, bihb, whhb, bhhb)
    fc_params = (wfc, bfc)

    out = seq_classifier_forward(tokens, embeddings, gru_params, fc_params)
    out = jax.block_until_ready(out)
    assert out.shape == (B, C), out.shape

    ref = jax.block_until_ready(
        seq_classifier_reference(tokens, embeddings, gru_params, fc_params))
    np.testing.assert_allclose(np.asarray(out), np.asarray(ref), atol=5e-2, rtol=5e-2)

    print("KERNEL_OK")
</pallas_src>

<mosaic_0001>
module attributes {stable_mosaic.version = 11 : i64} {
  func.func @kernel(%arg0: memref<16xi32, #tpu.memory_space<smem>>, %arg1: memref<50x32xf32, #tpu.memory_space<vmem>>, %arg2: memref<64x384xbf16, #tpu.memory_space<vmem>>, %arg3: memref<1x384xf32, #tpu.memory_space<vmem>>, %arg4: memref<128x384xbf16, #tpu.memory_space<vmem>>, %arg5: memref<1x128xf32, #tpu.memory_space<vmem>>, %arg6: memref<128x128xbf16, #tpu.memory_space<vmem>>, %arg7: memref<1x128xf32, #tpu.memory_space<vmem>>, %arg8: memref<8x128xf32, #tpu.memory_space<vmem>>, %arg9: memref<64x64xf32, #tpu.memory_space<vmem>>, %arg10: memref<64x384xf32, #tpu.memory_space<vmem>>) attributes {dimension_semantics = [], scalar_prefetch = 1 : i64, scratch_operands = 2 : i64, tpu.core_type = #tpu.core_type<tc>} {
    %cst = arith.constant 0.000000e+00 : f32
    %0 = vector.broadcast %cst : f32 to vector<64x64xf32>
    %c0 = arith.constant 0 : index
    %c0_0 = arith.constant 0 : index
    %1 = vector.load %arg9[%c0, %c0_0] : memref<64x64xf32, #tpu.memory_space<vmem>>, vector<64x64xf32>
    tpu.vector_store %arg9[%c0, %c0_0], %0 {strides = array<i32>} : memref<64x64xf32, #tpu.memory_space<vmem>>, vector<64x64xf32>,
    %c0_1 = arith.constant 0 : index
    %2 = memref.load %arg0[%c0_1] : memref<16xi32, #tpu.memory_space<smem>>
    %c7 = arith.constant 7 : index
    %3 = memref.load %arg0[%c7] : memref<16xi32, #tpu.memory_space<smem>>
    %4 = arith.index_cast %2 : i32 to index
    %c0_2 = arith.constant 0 : index
    %5 = vector.load %arg1[%4, %c0_2] : memref<50x32xf32, #tpu.memory_space<vmem>>, vector<1x32xf32>
    %c0_3 = arith.constant 0 : index
    %c0_4 = arith.constant 0 : index
    %6 = vector.load %arg9[%c0_3, %c0_4] : memref<64x64xf32, #tpu.memory_space<vmem>>, vector<1x32xf32>
    tpu.vector_store %arg9[%c0_3, %c0_4], %5 {strides = array<i32>} : memref<64x64xf32, #tpu.memory_space<vmem>>, vector<1x32xf32>,
    %7 = arith.index_cast %3 : i32 to index
    %c0_5 = arith.constant 0 : index
    %8 = vector.load %arg1[%7, %c0_5] : memref<50x32xf32, #tpu.memory_space<vmem>>, vector<1x32xf32>
    %c0_6 = arith.constant 0 : index
    %c32 = arith.constant 32 : index
    %9 = vector.load %arg9[%c0_6, %c32] : memref<64x64xf32, #tpu.memory_space<vmem>>, vector<1x32xf32>
    tpu.vector_store %arg9[%c0_6, %c32], %8 {strides = array<i32>} : memref<64x64xf32, #tpu.memory_space<vmem>>, vector<1x32xf32>,
    %c8 = arith.constant 8 : index
    %10 = memref.load %arg0[%c8] : memref<16xi32, #tpu.memory_space<smem>>
    %c15 = arith.constant 15 : index
    %11 = memref.load %arg0[%c15] : memref<16xi32, #tpu.memory_space<smem>>
    %12 = arith.index_cast %10 : i32 to index
    %c0_7 = arith.constant 0 : index
    %13 = vector.load %arg1[%12, %c0_7] : memref<50x32xf32, #tpu.memory_space<vmem>>, vector<1x32xf32>
    %c1 = arith.constant 1 : index
    %c0_8 = arith.constant 0 : index
    %14 = vector.load %arg9[%c1, %c0_8] : memref<64x64xf32, #tpu.memory_space<vmem>>, vector<1x32xf32>
    tpu.vector_store %arg9[%c1, %c0_8], %13 {strides = array<i32>} : memref<64x64xf32, #tpu.memory_space<vmem>>, vector<1x32xf32>,
    %15 = arith.index_cast %11 : i32 to index
    %c0_9 = arith.constant 0 : index
    %16 = vector.load %arg1[%15, %c0_9] : memref<50x32xf32, #tpu.memory_space<vmem>>, vector<1x32xf32>
    %c1_10 = arith.constant 1 : index
    %c32_11 = arith.constant 32 : index
    %17 = vector.load %arg9[%c1_10, %c32_11] : memref<64x64xf32, #tpu.memory_space<vmem>>, vector<1x32xf32>
    tpu.vector_store %arg9[%c1_10, %c32_11], %16 {strides = array<i32>} : memref<64x64xf32, #tpu.memory_space<vmem>>, vector<1x32xf32>,
    %c1_12 = arith.constant 1 : index
    %18 = memref.load %arg0[%c1_12] : memref<16xi32, #tpu.memory_space<smem>>
    %c6 = arith.constant 6 : index
    %19 = memref.load %arg0[%c6] : memref<16xi32, #tpu.memory_space<smem>>
    %20 = arith.index_cast %18 : i32 to index
    %c0_13 = arith.constant 0 : index
    %21 = vector.load %arg1[%20, %c0_13] : memref<50x32xf32, #tpu.memory_space<vmem>>, vector<1x32xf32>
    %c8_14 = arith.constant 8 : index
    %c0_15 = arith.constant 0 : index
    %22 = vector.load %arg9[%c8_14, %c0_15] : memref<64x64xf32, #tpu.memory_space<vmem>>, vector<1x32xf32>
    tpu.vector_store %arg9[%c8_14, %c0_15], %21 {strides = array<i32>} : memref<64x64xf32, #tpu.memory_space<vmem>>, vector<1x32xf32>,
    %23 = arith.index_cast %19 : i32 to index
    %c0_16 = arith.constant 0 : index
    %24 = vector.load %arg1[%23, %c0_16] : memref<50x32xf32, #tpu.memory_space<vmem>>, vector<1x32xf32>
    %c8_17 = arith.constant 8 : index
    %c32_18 = arith.constant 32 : index
    %25 = vector.load %arg9[%c8_17, %c32_18] : memref<64x64xf32, #tpu.memory_space<vmem>>, vector<1x32xf32>
    tpu.vector_store %arg9[%c8_17, %c32_18], %24 {strides = array<i32>} : memref<64x64xf32, #tpu.memory_space<vmem>>, vector<1x32xf32>,
    %c9 = arith.constant 9 : index
    %26 = memref.load %arg0[%c9] : memref<16xi32, #tpu.memory_space<smem>>
    %c14 = arith.constant 14 : index
    %27 = memref.load %arg0[%c14] : memref<16xi32, #tpu.memory_space<smem>>
    %28 = arith.index_cast %26 : i32 to index
    %c0_19 = arith.constant 0 : index
    %29 = vector.load %arg1[%28, %c0_19] : memref<50x32xf32, #tpu.memory_space<vmem>>, vector<1x32xf32>
    %c9_20 = arith.constant 9 : index
    %c0_21 = arith.constant 0 : index
    %30 = vector.load %arg9[%c9_20, %c0_21] : memref<64x64xf32, #tpu.memory_space<vmem>>, vector<1x32xf32>
    tpu.vector_store %arg9[%c9_20, %c0_21], %29 {strides = array<i32>} : memref<64x64xf32, #tpu.memory_space<vmem>>, vector<1x32xf32>,
    %31 = arith.index_cast %27 : i32 to index
    %c0_22 = arith.constant 0 : index
    %32 = vector.load %arg1[%31, %c0_22] : memref<50x32xf32, #tpu.memory_space<vmem>>, vector<1x32xf32>
    %c9_23 = arith.constant 9 : index
    %c32_24 = arith.constant 32 : index
    %33 = vector.load %arg9[%c9_23, %c32_24] : memref<64x64xf32, #tpu.memory_space<vmem>>, vector<1x32xf32>
    tpu.vector_store %arg9[%c9_23, %c32_24], %32 {strides = array<i32>} : memref<64x64xf32, #tpu.memory_space<vmem>>, vector<1x32xf32>,
    %c2 = arith.constant 2 : index
    %34 = memref.load %arg0[%c2] : memref<16xi32, #tpu.memory_space<smem>>
    %c5 = arith.constant 5 : index
    %35 = memref.load %arg0[%c5] : memref<16xi32, #tpu.memory_space<smem>>
    %36 = arith.index_cast %34 : i32 to index
    %c0_25 = arith.constant 0 : index
    %37 = vector.load %arg1[%36, %c0_25] : memref<50x32xf32, #tpu.memory_space<vmem>>, vector<1x32xf32>
    %c16 = arith.constant 16 : index
    %c0_26 = arith.constant 0 : index
    %38 = vector.load %arg9[%c16, %c0_26] : memref<64x64xf32, #tpu.memory_space<vmem>>, vector<1x32xf32>
    tpu.vector_store %arg9[%c16, %c0_26], %37 {strides = array<i32>} : memref<64x64xf32, #tpu.memory_space<vmem>>, vector<1x32xf32>,
    %39 = arith.index_cast %35 : i32 to index
    %c0_27 = arith.constant 0 : index
    %40 = vector.load %arg1[%39, %c0_27] : memref<50x32xf32, #tpu.memory_space<vmem>>, vector<1x32xf32>
    %c16_28 = arith.constant 16 : index
    %c32_29 = arith.constant 32 : index
    %41 = vector.load %arg9[%c16_28, %c32_29] : memref<64x64xf32, #tpu.memory_space<vmem>>, vector<1x32xf32>
    tpu.vector_store %arg9[%c16_28, %c32_29], %40 {strides = array<i32>} : memref<64x64xf32, #tpu.memory_space<vmem>>, vector<1x32xf32>,
    %c10 = arith.constant 10 : index
    %42 = memref.load %arg0[%c10] : memref<16xi32, #tpu.memory_space<smem>>
    %c13 = arith.constant 13 : index
    %43 = memref.load %arg0[%c13] : memref<16xi32, #tpu.memory_space<smem>>
    %44 = arith.index_cast %42 : i32 to index
    %c0_30 = arith.constant 0 : index
    %45 = vector.load %arg1[%44, %c0_30] : memref<50x32xf32, #tpu.memory_space<vmem>>, vector<1x32xf32>
    %c17 = arith.constant 17 : index
    %c0_31 = arith.constant 0 : index
    %46 = vector.load %arg9[%c17, %c0_31] : memref<64x64xf32, #tpu.memory_space<vmem>>, vector<1x32xf32>
    tpu.vector_store %arg9[%c17, %c0_31], %45 {strides = array<i32>} : memref<64x64xf32, #tpu.memory_space<vmem>>, vector<1x32xf32>,
    %47 = arith.index_cast %43 : i32 to index
    %c0_32 = arith.constant 0 : index
    %48 = vector.load %arg1[%47, %c0_32] : memref<50x32xf32, #tpu.memory_space<vmem>>, vector<1x32xf32>
    %c17_33 = arith.constant 17 : index
    %c32_34 = arith.constant 32 : index
    %49 = vector.load %arg9[%c17_33, %c32_34] : memref<64x64xf32, #tpu.memory_space<vmem>>, vector<1x32xf32>
    tpu.vector_store %arg9[%c17_33, %c32_34], %48 {strides = array<i32>} : memref<64x64xf32, #tpu.memory_space<vmem>>, vector<1x32xf32>,
    %c3 = arith.constant 3 : index
    %50 = memref.load %arg0[%c3] : memref<16xi32, #tpu.memory_space<smem>>
    %c4 = arith.constant 4 : index
    %51 = memref.load %arg0[%c4] : memref<16xi32, #tpu.memory_space<smem>>
    %52 = arith.index_cast %50 : i32 to index
    %c0_35 = arith.constant 0 : index
    %53 = vector.load %arg1[%52, %c0_35] : memref<50x32xf32, #tpu.memory_space<vmem>>, vector<1x32xf32>
    %c24 = arith.constant 24 : index
    %c0_36 = arith.constant 0 : index
    %54 = vector.load %arg9[%c24, %c0_36] : memref<64x64xf32, #tpu.memory_space<vmem>>, vector<1x32xf32>
    tpu.vector_store %arg9[%c24, %c0_36], %53 {strides = array<i32>} : memref<64x64xf32, #tpu.memory_space<vmem>>, vector<1x32xf32>,
    %55 = arith.index_cast %51 : i32 to index
    %c0_37 = arith.constant 0 : index
    %56 = vector.load %arg1[%55, %c0_37] : memref<50x32xf32, #tpu.memory_space<vmem>>, vector<1x32xf32>
    %c24_38 = arith.constant 24 : index
    %c32_39 = arith.constant 32 : index
    %57 = vector.load %arg9[%c24_38, %c32_39] : memref<64x64xf32, #tpu.memory_space<vmem>>, vector<1x32xf32>
    tpu.vector_store %arg9[%c24_38, %c32_39], %56 {strides = array<i32>} : memref<64x64xf32, #tpu.memory_space<vmem>>, vector<1x32xf32>,
    %c11 = arith.constant 11 : index
    %58 = memref.load %arg0[%c11] : memref<16xi32, #tpu.memory_space<smem>>
    %c12 = arith.constant 12 : index
    %59 = memref.load %arg0[%c12] : memref<16xi32, #tpu.memory_space<smem>>
    %60 = arith.index_cast %58 : i32 to index
    %c0_40 = arith.constant 0 : index
    %61 = vector.load %arg1[%60, %c0_40] : memref<50x32xf32, #tpu.memory_space<vmem>>, vector<1x32xf32>
    %c25 = arith.constant 25 : index
    %c0_41 = arith.constant 0 : index
    %62 = vector.load %arg9[%c25, %c0_41] : memref<64x64xf32, #tpu.memory_space<vmem>>, vector<1x32xf32>
    tpu.vector_store %arg9[%c25, %c0_41], %61 {strides = array<i32>} : memref<64x64xf32, #tpu.memory_space<vmem>>, vector<1x32xf32>,
    %63 = arith.index_cast %59 : i32 to index
    %c0_42 = arith.constant 0 : index
    %64 = vector.load %arg1[%63, %c0_42] : memref<50x32xf32, #tpu.memory_space<vmem>>, vector<1x32xf32>
    %c25_43 = arith.constant 25 : index
    %c32_44 = arith.constant 32 : index
    %65 = vector.load %arg9[%c25_43, %c32_44] : memref<64x64xf32, #tpu.memory_space<vmem>>, vector<1x32xf32>
    tpu.vector_store %arg9[%c25_43, %c32_44], %64 {strides = array<i32>} : memref<64x64xf32, #tpu.memory_space<vmem>>, vector<1x32xf32>,
    %c4_45 = arith.constant 4 : index
    %66 = memref.load %arg0[%c4_45] : memref<16xi32, #tpu.memory_space<smem>>
    %c3_46 = arith.constant 3 : index
    %67 = memref.load %arg0[%c3_46] : memref<16xi32, #tpu.memory_space<smem>>
    %68 = arith.index_cast %66 : i32 to index
    %c0_47 = arith.constant 0 : index
    %69 = vector.load %arg1[%68, %c0_47] : memref<50x32xf32, #tpu.memory_space<vmem>>, vector<1x32xf32>
    %c32_48 = arith.constant 32 : index
    %c0_49 = arith.constant 0 : index
    %70 = vector.load %arg9[%c32_48, %c0_49] : memref<64x64xf32, #tpu.memory_space<vmem>>, vector<1x32xf32>
    tpu.vector_store %arg9[%c32_48, %c0_49], %69 {strides = array<i32>} : memref<64x64xf32, #tpu.memory_space<vmem>>, vector<1x32xf32>,
    %71 = arith.index_cast %67 : i32 to index
    %c0_50 = arith.constant 0 : index
    %72 = vector.load %arg1[%71, %c0_50] : memref<50x32xf32, #tpu.memory_space<vmem>>, vector<1x32xf32>
    %c32_51 = arith.constant 32 : index
    %c32_52 = arith.constant 32 : index
    %73 = vector.load %arg9[%c32_51, %c32_52] : memref<64x64xf32, #tpu.memory_space<vmem>>, vector<1x32xf32>
    tpu.vector_store %arg9[%c32_51, %c32_52], %72 {strides = array<i32>} : memref<64x64xf32, #tpu.memory_space<vmem>>, vector<1x32xf32>,
    %c12_53 = arith.constant 12 : index
    %74 = memref.load %arg0[%c12_53] : memref<16xi32, #tpu.memory_space<smem>>
    %c11_54 = arith.constant 11 : index
    %75 = memref.load %arg0[%c11_54] : memref<16xi32, #tpu.memory_space<smem>>
    %76 = arith.index_cast %74 : i32 to index
    %c0_55 = arith.constant 0 : index
    %77 = vector.load %arg1[%76, %c0_55] : memref<50x32xf32, #tpu.memory_space<vmem>>, vector<1x32xf32>
    %c33 = arith.constant 33 : index
    %c0_56 = arith.constant 0 : index
    %78 = vector.load %arg9[%c33, %c0_56] : memref<64x64xf32, #tpu.memory_space<vmem>>, vector<1x32xf32>
    tpu.vector_store %arg9[%c33, %c0_56], %77 {strides = array<i32>} : memref<64x64xf32, #tpu.memory_space<vmem>>, vector<1x32xf32>,
    %79 = arith.index_cast %75 : i32 to index
    %c0_57 = arith.constant 0 : index
    %80 = vector.load %arg1[%79, %c0_57] : memref<50x32xf32, #tpu.memory_space<vmem>>, vector<1x32xf32>
    %c33_58 = arith.constant 33 : index
    %c32_59 = arith.constant 32 : index
    %81 = vector.load %arg9[%c33_58, %c32_59] : memref<64x64xf32, #tpu.memory_space<vmem>>, vector<1x32xf32>
    tpu.vector_store %arg9[%c33_58, %c32_59], %80 {strides = array<i32>} : memref<64x64xf32, #tpu.memory_space<vmem>>, vector<1x32xf32>,
    %c5_60 = arith.constant 5 : index
    %82 = memref.load %arg0[%c5_60] : memref<16xi32, #tpu.memory_space<smem>>
    %c2_61 = arith.constant 2 : index
    %83 = memref.load %arg0[%c2_61] : memref<16xi32, #tpu.memory_space<smem>>
    %84 = arith.index_cast %82 : i32 to index
    %c0_62 = arith.constant 0 : index
    %85 = vector.load %arg1[%84, %c0_62] : memref<50x32xf32, #tpu.memory_space<vmem>>, vector<1x32xf32>
    %c40 = arith.constant 40 : index
    %c0_63 = arith.constant 0 : index
    %86 = vector.load %arg9[%c40, %c0_63] : memref<64x64xf32, #tpu.memory_space<vmem>>, vector<1x32xf32>
    tpu.vector_store %arg9[%c40, %c0_63], %85 {strides = array<i32>} : memref<64x64xf32, #tpu.memory_space<vmem>>, vector<1x32xf32>,
    %87 = arith.index_cast %83 : i32 to index
    %c0_64 = arith.constant 0 : index
    %88 = vector.load %arg1[%87, %c0_64] : memref<50x32xf32, #tpu.memory_space<vmem>>, vector<1x32xf32>
    %c40_65 = arith.constant 40 : index
    %c32_66 = arith.constant 32 : index
    %89 = vector.load %arg9[%c40_65, %c32_66] : memref<64x64xf32, #tpu.memory_space<vmem>>, vector<1x32xf32>
    tpu.vector_store %arg9[%c40_65, %c32_66], %88 {strides = array<i32>} : memref<64x64xf32, #tpu.memory_space<vmem>>, vector<1x32xf32>,
    %c13_67 = arith.constant 13 : index
    %90 = memref.load %arg0[%c13_67] : memref<16xi32, #tpu.memory_space<smem>>
    %c10_68 = arith.constant 10 : index
    %91 = memref.load %arg0[%c10_68] : memref<16xi32, #tpu.memory_space<smem>>
    %92 = arith.index_cast %90 : i32 to index
    %c0_69 = arith.constant 0 : index
    %93 = vector.load %arg1[%92, %c0_69] : memref<50x32xf32, #tpu.memory_space<vmem>>, vector<1x32xf32>
    %c41 = arith.constant 41 : index
    %c0_70 = arith.constant 0 : index
    %94 = vector.load %arg9[%c41, %c0_70] : memref<64x64xf32, #tpu.memory_space<vmem>>, vector<1x32xf32>
    tpu.vector_store %arg9[%c41, %c0_70], %93 {strides = array<i32>} : memref<64x64xf32, #tpu.memory_space<vmem>>, vector<1x32xf32>,
    %95 = arith.index_cast %91 : i32 to index
    %c0_71 = arith.constant 0 : index
    %96 = vector.load %arg1[%95, %c0_71] : memref<50x32xf32, #tpu.memory_space<vmem>>, vector<1x32xf32>
    %c41_72 = arith.constant 41 : index
    %c32_73 = arith.constant 32 : index
    %97 = vector.load %arg9[%c41_72, %c32_73] : memref<64x64xf32, #tpu.memory_space<vmem>>, vector<1x32xf32>
    tpu.vector_store %arg9[%c41_72, %c32_73], %96 {strides = array<i32>} : memref<64x64xf32, #tpu.memory_space<vmem>>, vector<1x32xf32>,
    %c6_74 = arith.constant 6 : index
    %98 = memref.load %arg0[%c6_74] : memref<16xi32, #tpu.memory_space<smem>>
    %c1_75 = arith.constant 1 : index
    %99 = memref.load %arg0[%c1_75] : memref<16xi32, #tpu.memory_space<smem>>
    %100 = arith.index_cast %98 : i32 to index
    %c0_76 = arith.constant 0 : index
    %101 = vector.load %arg1[%100, %c0_76] : memref<50x32xf32, #tpu.memory_space<vmem>>, vector<1x32xf32>
    %c48 = arith.constant 48 : index
    %c0_77 = arith.constant 0 : index
    %102 = vector.load %arg9[%c48, %c0_77] : memref<64x64xf32, #tpu.memory_space<vmem>>, vector<1x32xf32>
    tpu.vector_store %arg9[%c48, %c0_77], %101 {strides = array<i32>} : memref<64x64xf32, #tpu.memory_space<vmem>>, vector<1x32xf32>,
    %103 = arith.index_cast %99 : i32 to index
    %c0_78 = arith.constant 0 : index
    %104 = vector.load %arg1[%103, %c0_78] : memref<50x32xf32, #tpu.memory_space<vmem>>, vector<1x32xf32>
    %c48_79 = arith.constant 48 : index
    %c32_80 = arith.constant 32 : index
    %105 = vector.load %arg9[%c48_79, %c32_80] : memref<64x64xf32, #tpu.memory_space<vmem>>, vector<1x32xf32>
    tpu.vector_store %arg9[%c48_79, %c32_80], %104 {strides = array<i32>} : memref<64x64xf32, #tpu.memory_space<vmem>>, vector<1x32xf32>,
    %c14_81 = arith.constant 14 : index
    %106 = memref.load %arg0[%c14_81] : memref<16xi32, #tpu.memory_space<smem>>
    %c9_82 = arith.constant 9 : index
    %107 = memref.load %arg0[%c9_82] : memref<16xi32, #tpu.memory_space<smem>>
    %108 = arith.index_cast %106 : i32 to index
    %c0_83 = arith.constant 0 : index
    %109 = vector.load %arg1[%108, %c0_83] : memref<50x32xf32, #tpu.memory_space<vmem>>, vector<1x32xf32>
    %c49 = arith.constant 49 : index
    %c0_84 = arith.constant 0 : index
    %110 = vector.load %arg9[%c49, %c0_84] : memref<64x64xf32, #tpu.memory_space<vmem>>, vector<1x32xf32>
    tpu.vector_store %arg9[%c49, %c0_84], %109 {strides = array<i32>} : memref<64x64xf32, #tpu.memory_space<vmem>>, vector<1x32xf32>,
    %111 = arith.index_cast %107 : i32 to index
    %c0_85 = arith.constant 0 : index
    %112 = vector.load %arg1[%111, %c0_85] : memref<50x32xf32, #tpu.memory_space<vmem>>, vector<1x32xf32>
    %c49_86 = arith.constant 49 : index
    %c32_87 = arith.constant 32 : index
    %113 = vector.load %arg9[%c49_86, %c32_87] : memref<64x64xf32, #tpu.memory_space<vmem>>, vector<1x32xf32>
    tpu.vector_store %arg9[%c49_86, %c32_87], %112 {strides = array<i32>} : memref<64x64xf32, #tpu.memory_space<vmem>>, vector<1x32xf32>,
    %c7_88 = arith.constant 7 : index
    %114 = memref.load %arg0[%c7_88] : memref<16xi32, #tpu.memory_space<smem>>
    %c0_89 = arith.constant 0 : index
    %115 = memref.load %arg0[%c0_89] : memref<16xi32, #tpu.memory_space<smem>>
    %116 = arith.index_cast %114 : i32 to index
    %c0_90 = arith.constant 0 : index
    %117 = vector.load %arg1[%116, %c0_90] : memref<50x32xf32, #tpu.memory_space<vmem>>, vector<1x32xf32>
    %c56 = arith.constant 56 : index
    %c0_91 = arith.constant 0 : index
    %118 = vector.load %arg9[%c56, %c0_91] : memref<64x64xf32, #tpu.memory_space<vmem>>, vector<1x32xf32>
    tpu.vector_store %arg9[%c56, %c0_91], %117 {strides = array<i32>} : memref<64x64xf32, #tpu.memory_space<vmem>>, vector<1x32xf32>,
    %119 = arith.index_cast %115 : i32 to index
    %c0_92 = arith.constant 0 : index
    %120 = vector.load %arg1[%119, %c0_92] : memref<50x32xf32, #tpu.memory_space<vmem>>, vector<1x32xf32>
    %c56_93 = arith.constant 56 : index
    %c32_94 = arith.constant 32 : index
    %121 = vector.load %arg9[%c56_93, %c32_94] : memref<64x64xf32, #tpu.memory_space<vmem>>, vector<1x32xf32>
    tpu.vector_store %arg9[%c56_93, %c32_94], %120 {strides = array<i32>} : memref<64x64xf32, #tpu.memory_space<vmem>>, vector<1x32xf32>,
    %c15_95 = arith.constant 15 : index
    %122 = memref.load %arg0[%c15_95] : memref<16xi32, #tpu.memory_space<smem>>
    %c8_96 = arith.constant 8 : index
    %123 = memref.load %arg0[%c8_96] : memref<16xi32, #tpu.memory_space<smem>>
    %124 = arith.index_cast %122 : i32 to index
    %c0_97 = arith.constant 0 : index
    %125 = vector.load %arg1[%124, %c0_97] : memref<50x32xf32, #tpu.memory_space<vmem>>, vector<1x32xf32>
    %c57 = arith.constant 57 : index
    %c0_98 = arith.constant 0 : index
    %126 = vector.load %arg9[%c57, %c0_98] : memref<64x64xf32, #tpu.memory_space<vmem>>, vector<1x32xf32>
    tpu.vector_store %arg9[%c57, %c0_98], %125 {strides = array<i32>} : memref<64x64xf32, #tpu.memory_space<vmem>>, vector<1x32xf32>,
    %127 = arith.index_cast %123 : i32 to index
    %c0_99 = arith.constant 0 : index
    %128 = vector.load %arg1[%127, %c0_99] : memref<50x32xf32, #tpu.memory_space<vmem>>, vector<1x32xf32>
    %c57_100 = arith.constant 57 : index
    %c32_101 = arith.constant 32 : index
    %129 = vector.load %arg9[%c57_100, %c32_101] : memref<64x64xf32, #tpu.memory_space<vmem>>, vector<1x32xf32>
    tpu.vector_store %arg9[%c57_100, %c32_101], %128 {strides = array<i32>} : memref<64x64xf32, #tpu.memory_space<vmem>>, vector<1x32xf32>,
    %c0_102 = arith.constant 0 : index
    %c0_103 = arith.constant 0 : index
    %130 = vector.load %arg9[%c0_102, %c0_103] : memref<64x64xf32, #tpu.memory_space<vmem>>, vector<64x64xf32>
    %131 = arith.truncf %130 : vector<64x64xf32> to vector<64x64xbf16>
    %c0_104 = arith.constant 0 : index
    %c0_105 = arith.constant 0 : index
    %132 = vector.load %arg2[%c0_104, %c0_105] : memref<64x384xbf16, #tpu.memory_space<vmem>>, vector<64x384xbf16>
    %cst_106 = arith.constant dense<0.000000e+00> : vector<64x384xf32>
    %133 = tpu.matmul %131, %132, %cst_106 {dimension_numbers = #tpu.dot_dimension_numbers<[1], [0], [0], [1], [0, 0, 1, 1], [], []>} : vector<64x64xbf16>, vector<64x384xbf16>, vector<64x384xf32> -> vector<64x384xf32>
    %c0_107 = arith.constant 0 : index
    %c0_108 = arith.constant 0 : index
    %134 = vector.load %arg3[%c0_107, %c0_108] : memref<1x384xf32, #tpu.memory_space<vmem>>, vector<1x384xf32>
    %135 = vector.broadcast %134 : vector<1x384xf32> to vector<64x384xf32>
    %136 = arith.addf %133, %135 : vector<64x384xf32>
    %c0_109 = arith.constant 0 : index
    %c0_110 = arith.constant 0 : index
    %137 = vector.load %arg10[%c0_109, %c0_110] : memref<64x384xf32, #tpu.memory_space<vmem>>, vector<64x384xf32>
    tpu.vector_store %arg10[%c0_109, %c0_110], %136 {strides = array<i32>} : memref<64x384xf32, #tpu.memory_space<vmem>>, vector<64x384xf32>,
    %c0_111 = arith.constant 0 : index
    %c0_112 = arith.constant 0 : index
    %138 = vector.load %arg5[%c0_111, %c0_112] : memref<1x128xf32, #tpu.memory_space<vmem>>, vector<1x128xf32>
    %139 = vector.shape_cast %138 : vector<1x128xf32> to vector<1x128xf32>
    %140 = vector.broadcast %139 : vector<1x128xf32> to vector<8x128xf32>
    %cst_113 = arith.constant 0.000000e+00 : f32
    %141 = vector.broadcast %cst_113 : f32 to vector<8x128xf32>
    %cst_114 = arith.constant -1.000000e+30 : f32
    %142 = vector.broadcast %cst_114 : f32 to vector<8x128xf32>
    %c0_115 = arith.constant 0 : index
    %c0_116 = arith.constant 0 : index
    %143 = vector.load %arg10[%c0_115, %c0_116] : memref<64x384xf32, #tpu.memory_space<vmem>>, vector<8x384xf32>
    %144 = arith.truncf %141 : vector<8x128xf32> to vector<8x128xbf16>
    %c0_117 = arith.constant 0 : index
    %c0_118 = arith.constant 0 : index
    %145 = vector.load %arg4[%c0_117, %c0_118] : memref<128x384xbf16, #tpu.memory_space<vmem>>, vector<128x384xbf16>
    %cst_119 = arith.constant dense<0.000000e+00> : vector<8x384xf32>
    %146 = tpu.matmul %144, %145, %cst_119 {dimension_numbers = #tpu.dot_dimension_numbers<[1], [0], [0], [1], [0, 0, 1, 1], [], []>} : vector<8x128xbf16>, vector<128x384xbf16>, vector<8x384xf32> -> vector<8x384xf32>
    %147 = vector.extract_strided_slice %143 {offsets = [0, 0], sizes = [8, 128], strides = [1, 1]} : vector<8x384xf32> to vector<8x128xf32>
    %148 = vector.extract_strided_slice %146 {offsets = [0, 0], sizes = [8, 128], strides = [1, 1]} : vector<8x384xf32> to vector<8x128xf32>
    %149 = arith.addf %147, %148 : vector<8x128xf32>
    %150 = arith.negf %149 : vector<8x128xf32>
    %151 = math.exp %150 : vector<8x128xf32>
    %cst_120 = arith.constant 1.000000e+00 : f32
    %152 = vector.broadcast %cst_120 : f32 to vector<8x128xf32>
    %153 = arith.addf %152, %151 : vector<8x128xf32>
    %154 = arith.divf %152, %153 : vector<8x128xf32>
    %155 = vector.extract_strided_slice %143 {offsets = [0, 128], sizes = [8, 128], strides = [1, 1]} : vector<8x384xf32> to vector<8x128xf32>
    %156 = vector.extract_strided_slice %146 {offsets = [0, 128], sizes = [8, 128], strides = [1, 1]} : vector<8x384xf32> to vector<8x128xf32>
    %157 = arith.addf %155, %156 : vector<8x128xf32>
    %158 = arith.negf %157 : vector<8x128xf32>
    %159 = math.exp %158 : vector<8x128xf32>
    %cst_121 = arith.constant 1.000000e+00 : f32
    %160 = vector.broadcast %cst_121 : f32 to vector<8x128xf32>
    %161 = arith.addf %160, %159 : vector<8x128xf32>
    %162 = arith.divf %160, %161 : vector<8x128xf32>
    %163 = vector.extract_strided_slice %143 {offsets = [0, 256], sizes = [8, 128], strides = [1, 1]} : vector<8x384xf32> to vector<8x128xf32>
    %164 = vector.extract_strided_slice %146 {offsets = [0, 256], sizes = [8, 128], strides = [1, 1]} : vector<8x384xf32> to vector<8x128xf32>
    %165 = arith.addf %164, %140 : vector<8x128xf32>
    %166 = arith.mulf %154, %165 : vector<8x128xf32>
    %167 = arith.addf %163, %166 : vector<8x128xf32>
    %168 = math.tanh %167 : vector<8x128xf32>
    %cst_122 = arith.constant 1.000000e+00 : f32
    %169 = vector.broadcast %cst_122 : f32 to vector<8x128xf32>
    %170 = arith.subf %169, %162 : vector<8x128xf32>
    %171 = arith.mulf %170, %168 : vector<8x128xf32>
    %172 = arith.mulf %162, %141 : vector<8x128xf32>
    %173 = arith.addf %171, %172 : vector<8x128xf32>
    %174 = arith.maximumf %142, %173 : vector<8x128xf32>
    %c8_123 = arith.constant 8 : index
    %c0_124 = arith.constant 0 : index
    %175 = vector.load %arg10[%c8_123, %c0_124] : memref<64x384xf32, #tpu.memory_space<vmem>>, vector<8x384xf32>
    %176 = arith.truncf %173 : vector<8x128xf32> to vector<8x128xbf16>
    %c0_125 = arith.constant 0 : index
    %c0_126 = arith.constant 0 : index
    %177 = vector.load %arg4[%c0_125, %c0_126] : memref<128x384xbf16, #tpu.memory_space<vmem>>, vector<128x384xbf16>
    %cst_127 = arith.constant dense<0.000000e+00> : vector<8x384xf32>
    %178 = tpu.matmul %176, %177, %cst_127 {dimension_numbers = #tpu.dot_dimension_numbers<[1], [0], [0], [1], [0, 0, 1, 1], [], []>} : vector<8x128xbf16>, vector<128x384xbf16>, vector<8x384xf32> -> vector<8x384xf32>
    %179 = vector.extract_strided_slice %175 {offsets = [0, 0], sizes = [8, 128], strides = [1, 1]} : vector<8x384xf32> to vector<8x128xf32>
    %180 = vector.extract_strided_slice %178 {offsets = [0, 0], sizes = [8, 128], strides = [1, 1]} : vector<8x384xf32> to vector<8x128xf32>
    %181 = arith.addf %179, %180 : vector<8x128xf32>
    %182 = arith.negf %181 : vector<8x128xf32>
    %183 = math.exp %182 : vector<8x128xf32>
    %cst_128 = arith.constant 1.000000e+00 : f32
    %184 = vector.broadcast %cst_128 : f32 to vector<8x128xf32>
    %185 = arith.addf %184, %183 : vector<8x128xf32>
    %186 = arith.divf %184, %185 : vector<8x128xf32>
    %187 = vector.extract_strided_slice %175 {offsets = [0, 128], sizes = [8, 128], strides = [1, 1]} : vector<8x384xf32> to vector<8x128xf32>
    %188 = vector.extract_strided_slice %178 {offsets = [0, 128], sizes = [8, 128], strides = [1, 1]} : vector<8x384xf32> to vector<8x128xf32>
    %189 = arith.addf %187, %188 : vector<8x128xf32>
    %190 = arith.negf %189 : vector<8x128xf32>
    %191 = math.exp %190 : vector<8x128xf32>
    %cst_129 = arith.constant 1.000000e+00 : f32
    %192 = vector.broadcast %cst_129 : f32 to vector<8x128xf32>
    %193 = arith.addf %192, %191 : vector<8x128xf32>
    %194 = arith.divf %192, %193 : vector<8x128xf32>
    %195 = vector.extract_strided_slice %175 {offsets = [0, 256], sizes = [8, 128], strides = [1, 1]} : vector<8x384xf32> to vector<8x128xf32>
    %196 = vector.extract_strided_slice %178 {offsets = [0, 256], sizes = [8, 128], strides = [1, 1]} : vector<8x384xf32> to vector<8x128xf32>
    %197 = arith.addf %196, %140 : vector<8x128xf32>
    %198 = arith.mulf %186, %197 : vector<8x128xf32>
    %199 = arith.addf %195, %198 : vector<8x128xf32>
    %200 = math.tanh %199 : vector<8x128xf32>
    %cst_130 = arith.constant 1.000000e+00 : f32
    %201 = vector.broadcast %cst_130 : f32 to vector<8x128xf32>
    %202 = arith.subf %201, %194 : vector<8x128xf32>
    %203 = arith.mulf %202, %200 : vector<8x128xf32>
    %204 = arith.mulf %194, %173 : vector<8x128xf32>
    %205 = arith.addf %203, %204 : vector<8x128xf32>
    %206 = arith.maximumf %174, %205 : vector<8x128xf32>
    %c16_131 = arith.constant 16 : index
    %c0_132 = arith.constant 0 : index
    %207 = vector.load %arg10[%c16_131, %c0_132] : memref<64x384xf32, #tpu.memory_space<vmem>>, vector<8x384xf32>
    %208 = arith.truncf %205 : vector<8x128xf32> to vector<8x128xbf16>
    %c0_133 = arith.constant 0 : index
    %c0_134 = arith.constant 0 : index
    %209 = vector.load %arg4[%c0_133, %c0_134] : memref<128x384xbf16, #tpu.memory_space<vmem>>, vector<128x384xbf16>
    %cst_135 = arith.constant dense<0.000000e+00> : vector<8x384xf32>
    %210 = tpu.matmul %208, %209, %cst_135 {dimension_numbers = #tpu.dot_dimension_numbers<[1], [0], [0], [1], [0, 0, 1, 1], [], []>} : vector<8x128xbf16>, vector<128x384xbf16>, vector<8x384xf32> -> vector<8x384xf32>
    %211 = vector.extract_strided_slice %207 {offsets = [0, 0], sizes = [8, 128], strides = [1, 1]} : vector<8x384xf32> to vector<8x128xf32>
    %212 = vector.extract_strided_slice %210 {offsets = [0, 0], sizes = [8, 128], strides = [1, 1]} : vector<8x384xf32> to vector<8x128xf32>
    %213 = arith.addf %211, %212 : vector<8x128xf32>
    %214 = arith.negf %213 : vector<8x128xf32>
    %215 = math.exp %214 : vector<8x128xf32>
    %cst_136 = arith.constant 1.000000e+00 : f32
    %216 = vector.broadcast %cst_136 : f32 to vector<8x128xf32>
    %217 = arith.addf %216, %215 : vector<8x128xf32>
    %218 = arith.divf %216, %217 : vector<8x128xf32>
    %219 = vector.extract_strided_slice %207 {offsets = [0, 128], sizes = [8, 128], strides = [1, 1]} : vector<8x384xf32> to vector<8x128xf32>
    %220 = vector.extract_strided_slice %210 {offsets = [0, 128], sizes = [8, 128], strides = [1, 1]} : vector<8x384xf32> to vector<8x128xf32>
    %221 = arith.addf %219, %220 : vector<8x128xf32>
    %222 = arith.negf %221 : vector<8x128xf32>
    %223 = math.exp %222 : vector<8x128xf32>
    %cst_137 = arith.constant 1.000000e+00 : f32
    %224 = vector.broadcast %cst_137 : f32 to vector<8x128xf32>
    %225 = arith.addf %224, %223 : vector<8x128xf32>
    %226 = arith.divf %224, %225 : vector<8x128xf32>
    %227 = vector.extract_strided_slice %207 {offsets = [0, 256], sizes = [8, 128], strides = [1, 1]} : vector<8x384xf32> to vector<8x128xf32>
    %228 = vector.extract_strided_slice %210 {offsets = [0, 256], sizes = [8, 128], strides = [1, 1]} : vector<8x384xf32> to vector<8x128xf32>
    %229 = arith.addf %228, %140 : vector<8x128xf32>
    %230 = arith.mulf %218, %229 : vector<8x128xf32>
    %231 = arith.addf %227, %230 : vector<8x128xf32>
    %232 = math.tanh %231 : vector<8x128xf32>
    %cst_138 = arith.constant 1.000000e+00 : f32
    %233 = vector.broadcast %cst_138 : f32 to vector<8x128xf32>
    %234 = arith.subf %233, %226 : vector<8x128xf32>
    %235 = arith.mulf %234, %232 : vector<8x128xf32>
    %236 = arith.mulf %226, %205 : vector<8x128xf32>
    %237 = arith.addf %235, %236 : vector<8x128xf32>
    %238 = arith.maximumf %206, %237 : vector<8x128xf32>
    %c24_139 = arith.constant 24 : index
    %c0_140 = arith.constant 0 : index
    %239 = vector.load %arg10[%c24_139, %c0_140] : memref<64x384xf32, #tpu.memory_space<vmem>>, vector<8x384xf32>
    %240 = arith.truncf %237 : vector<8x128xf32> to vector<8x128xbf16>
    %c0_141 = arith.constant 0 : index
    %c0_142 = arith.constant 0 : index
    %241 = vector.load %arg4[%c0_141, %c0_142] : memref<128x384xbf16, #tpu.memory_space<vmem>>, vector<128x384xbf16>
    %cst_143 = arith.constant dense<0.000000e+00> : vector<8x384xf32>
    %242 = tpu.matmul %240, %241, %cst_143 {dimension_numbers = #tpu.dot_dimension_numbers<[1], [0], [0], [1], [0, 0, 1, 1], [], []>} : vector<8x128xbf16>, vector<128x384xbf16>, vector<8x384xf32> -> vector<8x384xf32>
    %243 = vector.extract_strided_slice %239 {offsets = [0, 0], sizes = [8, 128], strides = [1, 1]} : vector<8x384xf32> to vector<8x128xf32>
    %244 = vector.extract_strided_slice %242 {offsets = [0, 0], sizes = [8, 128], strides = [1, 1]} : vector<8x384xf32> to vector<8x128xf32>
    %245 = arith.addf %243, %244 : vector<8x128xf32>
    %246 = arith.negf %245 : vector<8x128xf32>
    %247 = math.exp %246 : vector<8x128xf32>
    %cst_144 = arith.constant 1.000000e+00 : f32
    %248 = vector.broadcast %cst_144 : f32 to vector<8x128xf32>
    %249 = arith.addf %248, %247 : vector<8x128xf32>
    %250 = arith.divf %248, %249 : vector<8x128xf32>
    %251 = vector.extract_strided_slice %239 {offsets = [0, 128], sizes = [8, 128], strides = [1, 1]} : vector<8x384xf32> to vector<8x128xf32>
    %252 = vector.extract_strided_slice %242 {offsets = [0, 128], sizes = [8, 128], strides = [1, 1]} : vector<8x384xf32> to vector<8x128xf32>
    %253 = arith.addf %251, %252 : vector<8x128xf32>
    %254 = arith.negf %253 : vector<8x128xf32>
    %255 = math.exp %254 : vector<8x128xf32>
    %cst_145 = arith.constant 1.000000e+00 : f32
    %256 = vector.broadcast %cst_145 : f32 to vector<8x128xf32>
    %257 = arith.addf %256, %255 : vector<8x128xf32>
    %258 = arith.divf %256, %257 : vector<8x128xf32>
    %259 = vector.extract_strided_slice %239 {offsets = [0, 256], sizes = [8, 128], strides = [1, 1]} : vector<8x384xf32> to vector<8x128xf32>
    %260 = vector.extract_strided_slice %242 {offsets = [0, 256], sizes = [8, 128], strides = [1, 1]} : vector<8x384xf32> to vector<8x128xf32>
    %261 = arith.addf %260, %140 : vector<8x128xf32>
    %262 = arith.mulf %250, %261 : vector<8x128xf32>
    %263 = arith.addf %259, %262 : vector<8x128xf32>
    %264 = math.tanh %263 : vector<8x128xf32>
    %cst_146 = arith.constant 1.000000e+00 : f32
    %265 = vector.broadcast %cst_146 : f32 to vector<8x128xf32>
    %266 = arith.subf %265, %258 : vector<8x128xf32>
    %267 = arith.mulf %266, %264 : vector<8x128xf32>
    %268 = arith.mulf %258, %237 : vector<8x128xf32>
    %269 = arith.addf %267, %268 : vector<8x128xf32>
    %270 = arith.maximumf %238, %269 : vector<8x128xf32>
    %c32_147 = arith.constant 32 : index
    %c0_148 = arith.constant 0 : index
    %271 = vector.load %arg10[%c32_147, %c0_148] : memref<64x384xf32, #tpu.memory_space<vmem>>, vector<8x384xf32>
    %272 = arith.truncf %269 : vector<8x128xf32> to vector<8x128xbf16>
    %c0_149 = arith.constant 0 : index
    %c0_150 = arith.constant 0 : index
    %273 = vector.load %arg4[%c0_149, %c0_150] : memref<128x384xbf16, #tpu.memory_space<vmem>>, vector<128x384xbf16>
    %cst_151 = arith.constant dense<0.000000e+00> : vector<8x384xf32>
    %274 = tpu.matmul %272, %273, %cst_151 {dimension_numbers = #tpu.dot_dimension_numbers<[1], [0], [0], [1], [0, 0, 1, 1], [], []>} : vector<8x128xbf16>, vector<128x384xbf16>, vector<8x384xf32> -> vector<8x384xf32>
    %275 = vector.extract_strided_slice %271 {offsets = [0, 0], sizes = [8, 128], strides = [1, 1]} : vector<8x384xf32> to vector<8x128xf32>
    %276 = vector.extract_strided_slice %274 {offsets = [0, 0], sizes = [8, 128], strides = [1, 1]} : vector<8x384xf32> to vector<8x128xf32>
    %277 = arith.addf %275, %276 : vector<8x128xf32>
    %278 = arith.negf %277 : vector<8x128xf32>
    %279 = math.exp %278 : vector<8x128xf32>
    %cst_152 = arith.constant 1.000000e+00 : f32
    %280 = vector.broadcast %cst_152 : f32 to vector<8x128xf32>
    %281 = arith.addf %280, %279 : vector<8x128xf32>
    %282 = arith.divf %280, %281 : vector<8x128xf32>
    %283 = vector.extract_strided_slice %271 {offsets = [0, 128], sizes = [8, 128], strides = [1, 1]} : vector<8x384xf32> to vector<8x128xf32>
    %284 = vector.extract_strided_slice %274 {offsets = [0, 128], sizes = [8, 128], strides = [1, 1]} : vector<8x384xf32> to vector<8x128xf32>
    %285 = arith.addf %283, %284 : vector<8x128xf32>
    %286 = arith.negf %285 : vector<8x128xf32>
    %287 = math.exp %286 : vector<8x128xf32>
    %cst_153 = arith.constant 1.000000e+00 : f32
    %288 = vector.broadcast %cst_153 : f32 to vector<8x128xf32>
    %289 = arith.addf %288, %287 : vector<8x128xf32>
    %290 = arith.divf %288, %289 : vector<8x128xf32>
    %291 = vector.extract_strided_slice %271 {offsets = [0, 256], sizes = [8, 128], strides = [1, 1]} : vector<8x384xf32> to vector<8x128xf32>
    %292 = vector.extract_strided_slice %274 {offsets = [0, 256], sizes = [8, 128], strides = [1, 1]} : vector<8x384xf32> to vector<8x128xf32>
    %293 = arith.addf %292, %140 : vector<8x128xf32>
    %294 = arith.mulf %282, %293 : vector<8x128xf32>
    %295 = arith.addf %291, %294 : vector<8x128xf32>
    %296 = math.tanh %295 : vector<8x128xf32>
    %cst_154 = arith.constant 1.000000e+00 : f32
    %297 = vector.broadcast %cst_154 : f32 to vector<8x128xf32>
    %298 = arith.subf %297, %290 : vector<8x128xf32>
    %299 = arith.mulf %298, %296 : vector<8x128xf32>
    %300 = arith.mulf %290, %269 : vector<8x128xf32>
    %301 = arith.addf %299, %300 : vector<8x128xf32>
    %302 = arith.maximumf %270, %301 : vector<8x128xf32>
    %c40_155 = arith.constant 40 : index
    %c0_156 = arith.constant 0 : index
    %303 = vector.load %arg10[%c40_155, %c0_156] : memref<64x384xf32, #tpu.memory_space<vmem>>, vector<8x384xf32>
    %304 = arith.truncf %301 : vector<8x128xf32> to vector<8x128xbf16>
    %c0_157 = arith.constant 0 : index
    %c0_158 = arith.constant 0 : index
    %305 = vector.load %arg4[%c0_157, %c0_158] : memref<128x384xbf16, #tpu.memory_space<vmem>>, vector<128x384xbf16>
    %cst_159 = arith.constant dense<0.000000e+00> : vector<8x384xf32>
    %306 = tpu.matmul %304, %305, %cst_159 {dimension_numbers = #tpu.dot_dimension_numbers<[1], [0], [0], [1], [0, 0, 1, 1], [], []>} : vector<8x128xbf16>, vector<128x384xbf16>, vector<8x384xf32> -> vector<8x384xf32>
    %307 = vector.extract_strided_slice %303 {offsets = [0, 0], sizes = [8, 128], strides = [1, 1]} : vector<8x384xf32> to vector<8x128xf32>
    %308 = vector.extract_strided_slice %306 {offsets = [0, 0], sizes = [8, 128], strides = [1, 1]} : vector<8x384xf32> to vector<8x128xf32>
    %309 = arith.addf %307, %308 : vector<8x128xf32>
    %310 = arith.negf %309 : vector<8x128xf32>
    %311 = math.exp %310 : vector<8x128xf32>
    %cst_160 = arith.constant 1.000000e+00 : f32
    %312 = vector.broadcast %cst_160 : f32 to vector<8x128xf32>
    %313 = arith.addf %312, %311 : vector<8x128xf32>
    %314 = arith.divf %312, %313 : vector<8x128xf32>
    %315 = vector.extract_strided_slice %303 {offsets = [0, 128], sizes = [8, 128], strides = [1, 1]} : vector<8x384xf32> to vector<8x128xf32>
    %316 = vector.extract_strided_slice %306 {offsets = [0, 128], sizes = [8, 128], strides = [1, 1]} : vector<8x384xf32> to vector<8x128xf32>
    %317 = arith.addf %315, %316 : vector<8x128xf32>
    %318 = arith.negf %317 : vector<8x128xf32>
    %319 = math.exp %318 : vector<8x128xf32>
    %cst_161 = arith.constant 1.000000e+00 : f32
    %320 = vector.broadcast %cst_161 : f32 to vector<8x128xf32>
    %321 = arith.addf %320, %319 : vector<8x128xf32>
    %322 = arith.divf %320, %321 : vector<8x128xf32>
    %323 = vector.extract_strided_slice %303 {offsets = [0, 256], sizes = [8, 128], strides = [1, 1]} : vector<8x384xf32> to vector<8x128xf32>
    %324 = vector.extract_strided_slice %306 {offsets = [0, 256], sizes = [8, 128], strides = [1, 1]} : vector<8x384xf32> to vector<8x128xf32>
    %325 = arith.addf %324, %140 : vector<8x128xf32>
    %326 = arith.mulf %314, %325 : vector<8x128xf32>
    %327 = arith.addf %323, %326 : vector<8x128xf32>
    %328 = math.tanh %327 : vector<8x128xf32>
    %cst_162 = arith.constant 1.000000e+00 : f32
    %329 = vector.broadcast %cst_162 : f32 to vector<8x128xf32>
    %330 = arith.subf %329, %322 : vector<8x128xf32>
    %331 = arith.mulf %330, %328 : vector<8x128xf32>
    %332 = arith.mulf %322, %301 : vector<8x128xf32>
    %333 = arith.addf %331, %332 : vector<8x128xf32>
    %334 = arith.maximumf %302, %333 : vector<8x128xf32>
    %c48_163 = arith.constant 48 : index
    %c0_164 = arith.constant 0 : index
    %335 = vector.load %arg10[%c48_163, %c0_164] : memref<64x384xf32, #tpu.memory_space<vmem>>, vector<8x384xf32>
    %336 = arith.truncf %333 : vector<8x128xf32> to vector<8x128xbf16>
    %c0_165 = arith.constant 0 : index
    %c0_166 = arith.constant 0 : index
    %337 = vector.load %arg4[%c0_165, %c0_166] : memref<128x384xbf16, #tpu.memory_space<vmem>>, vector<128x384xbf16>
    %cst_167 = arith.constant dense<0.000000e+00> : vector<8x384xf32>
    %338 = tpu.matmul %336, %337, %cst_167 {dimension_numbers = #tpu.dot_dimension_numbers<[1], [0], [0], [1], [0, 0, 1, 1], [], []>} : vector<8x128xbf16>, vector<128x384xbf16>, vector<8x384xf32> -> vector<8x384xf32>
    %339 = vector.extract_strided_slice %335 {offsets = [0, 0], sizes = [8, 128], strides = [1, 1]} : vector<8x384xf32> to vector<8x128xf32>
    %340 = vector.extract_strided_slice %338 {offsets = [0, 0], sizes = [8, 128], strides = [1, 1]} : vector<8x384xf32> to vector<8x128xf32>
    %341 = arith.addf %339, %340 : vector<8x128xf32>
    %342 = arith.negf %341 : vector<8x128xf32>
    %343 = math.exp %342 : vector<8x128xf32>
    %cst_168 = arith.constant 1.000000e+00 : f32
    %344 = vector.broadcast %cst_168 : f32 to vector<8x128xf32>
    %345 = arith.addf %344, %343 : vector<8x128xf32>
    %346 = arith.divf %344, %345 : vector<8x128xf32>
    %347 = vector.extract_strided_slice %335 {offsets = [0, 128], sizes = [8, 128], strides = [1, 1]} : vector<8x384xf32> to vector<8x128xf32>
    %348 = vector.extract_strided_slice %338 {offsets = [0, 128], sizes = [8, 128], strides = [1, 1]} : vector<8x384xf32> to vector<8x128xf32>
    %349 = arith.addf %347, %348 : vector<8x128xf32>
    %350 = arith.negf %349 : vector<8x128xf32>
    %351 = math.exp %350 : vector<8x128xf32>
    %cst_169 = arith.constant 1.000000e+00 : f32
    %352 = vector.broadcast %cst_169 : f32 to vector<8x128xf32>
    %353 = arith.addf %352, %351 : vector<8x128xf32>
    %354 = arith.divf %352, %353 : vector<8x128xf32>
    %355 = vector.extract_strided_slice %335 {offsets = [0, 256], sizes = [8, 128], strides = [1, 1]} : vector<8x384xf32> to vector<8x128xf32>
    %356 = vector.extract_strided_slice %338 {offsets = [0, 256], sizes = [8, 128], strides = [1, 1]} : vector<8x384xf32> to vector<8x128xf32>
    %357 = arith.addf %356, %140 : vector<8x128xf32>
    %358 = arith.mulf %346, %357 : vector<8x128xf32>
    %359 = arith.addf %355, %358 : vector<8x128xf32>
    %360 = math.tanh %359 : vector<8x128xf32>
    %cst_170 = arith.constant 1.000000e+00 : f32
    %361 = vector.broadcast %cst_170 : f32 to vector<8x128xf32>
    %362 = arith.subf %361, %354 : vector<8x128xf32>
    %363 = arith.mulf %362, %360 : vector<8x128xf32>
    %364 = arith.mulf %354, %333 : vector<8x128xf32>
    %365 = arith.addf %363, %364 : vector<8x128xf32>
    %366 = arith.maximumf %334, %365 : vector<8x128xf32>
    %c56_171 = arith.constant 56 : index
    %c0_172 = arith.constant 0 : index
    %367 = vector.load %arg10[%c56_171, %c0_172] : memref<64x384xf32, #tpu.memory_space<vmem>>, vector<8x384xf32>
    %368 = arith.truncf %365 : vector<8x128xf32> to vector<8x128xbf16>
    %c0_173 = arith.constant 0 : index
    %c0_174 = arith.constant 0 : index
    %369 = vector.load %arg4[%c0_173, %c0_174] : memref<128x384xbf16, #tpu.memory_space<vmem>>, vector<128x384xbf16>
    %cst_175 = arith.constant dense<0.000000e+00> : vector<8x384xf32>
    %370 = tpu.matmul %368, %369, %cst_175 {dimension_numbers = #tpu.dot_dimension_numbers<[1], [0], [0], [1], [0, 0, 1, 1], [], []>} : vector<8x128xbf16>, vector<128x384xbf16>, vector<8x384xf32> -> vector<8x384xf32>
    %371 = vector.extract_strided_slice %367 {offsets = [0, 0], sizes = [8, 128], strides = [1, 1]} : vector<8x384xf32> to vector<8x128xf32>
    %372 = vector.extract_strided_slice %370 {offsets = [0, 0], sizes = [8, 128], strides = [1, 1]} : vector<8x384xf32> to vector<8x128xf32>
    %373 = arith.addf %371, %372 : vector<8x128xf32>
    %374 = arith.negf %373 : vector<8x128xf32>
    %375 = math.exp %374 : vector<8x128xf32>
    %cst_176 = arith.constant 1.000000e+00 : f32
    %376 = vector.broadcast %cst_176 : f32 to vector<8x128xf32>
    %377 = arith.addf %376, %375 : vector<8x128xf32>
    %378 = arith.divf %376, %377 : vector<8x128xf32>
    %379 = vector.extract_strided_slice %367 {offsets = [0, 128], sizes = [8, 128], strides = [1, 1]} : vector<8x384xf32> to vector<8x128xf32>
    %380 = vector.extract_strided_slice %370 {offsets = [0, 128], sizes = [8, 128], strides = [1, 1]} : vector<8x384xf32> to vector<8x128xf32>
    %381 = arith.addf %379, %380 : vector<8x128xf32>
    %382 = arith.negf %381 : vector<8x128xf32>
    %383 = math.exp %382 : vector<8x128xf32>
    %cst_177 = arith.constant 1.000000e+00 : f32
    %384 = vector.broadcast %cst_177 : f32 to vector<8x128xf32>
    %385 = arith.addf %384, %383 : vector<8x128xf32>
    %386 = arith.divf %384, %385 : vector<8x128xf32>
    %387 = vector.extract_strided_slice %367 {offsets = [0, 256], sizes = [8, 128], strides = [1, 1]} : vector<8x384xf32> to vector<8x128xf32>
    %388 = vector.extract_strided_slice %370 {offsets = [0, 256], sizes = [8, 128], strides = [1, 1]} : vector<8x384xf32> to vector<8x128xf32>
    %389 = arith.addf %388, %140 : vector<8x128xf32>
    %390 = arith.mulf %378, %389 : vector<8x128xf32>
    %391 = arith.addf %387, %390 : vector<8x128xf32>
    %392 = math.tanh %391 : vector<8x128xf32>
    %cst_178 = arith.constant 1.000000e+00 : f32
    %393 = vector.broadcast %cst_178 : f32 to vector<8x128xf32>
    %394 = arith.subf %393, %386 : vector<8x128xf32>
    %395 = arith.mulf %394, %392 : vector<8x128xf32>
    %396 = arith.mulf %386, %365 : vector<8x128xf32>
    %397 = arith.addf %395, %396 : vector<8x128xf32>
    %398 = arith.maximumf %366, %397 : vector<8x128xf32>
    %399 = arith.truncf %398 : vector<8x128xf32> to vector<8x128xbf16>
    %c0_179 = arith.constant 0 : index
    %c0_180 = arith.constant 0 : index
    %400 = vector.load %arg6[%c0_179, %c0_180] : memref<128x128xbf16, #tpu.memory_space<vmem>>, vector<128x128xbf16>
    %cst_181 = arith.constant dense<0.000000e+00> : vector<8x128xf32>
    %401 = tpu.matmul %399, %400, %cst_181 {dimension_numbers = #tpu.dot_dimension_numbers<[1], [0], [0], [1], [0, 0, 1, 1], [], []>} : vector<8x128xbf16>, vector<128x128xbf16>, vector<8x128xf32> -> vector<8x128xf32>
    %c0_182 = arith.constant 0 : index
    %c0_183 = arith.constant 0 : index
    %402 = vector.load %arg7[%c0_182, %c0_183] : memref<1x128xf32, #tpu.memory_space<vmem>>, vector<1x128xf32>
    %403 = vector.broadcast %402 : vector<1x128xf32> to vector<8x128xf32>
    %404 = arith.addf %401, %403 : vector<8x128xf32>
    %c0_184 = arith.constant 0 : index
    %c0_185 = arith.constant 0 : index
    %405 = vector.load %arg8[%c0_184, %c0_185] : memref<8x128xf32, #tpu.memory_space<vmem>>, vector<8x128xf32>
    tpu.vector_store %arg8[%c0_184, %c0_185], %404 {strides = array<i32>} : memref<8x128xf32, #tpu.memory_space<vmem>>, vector<8x128xf32>,
    return
  }
}

</mosaic_0001>

<bundles_post_ra>
// kernel: seq_classifier_forward.1
= control target key start
LH: loop header
LB: loop body
LE: loop exit
PB: predicated region body
PF: predicated region fallthrough
CT: control target
= control target key end

     0   :  { %s3173_s0 = inlined_call_operand.vmem [shape: s32[16], index: 0, kind: input, shape index: {}]   ;;  %s3174_s1 = inlined_call_operand.vmem [shape: f32[50,32], index: 1, kind: input, shape index: {}]   ;;  %s3175_s2 = inlined_call_operand.vmem [shape: bf16[64,384], index: 2, kind: input, shape index: {}]   ;;  %s3176_s3 = inlined_call_operand.vmem [shape: f32[1,384], index: 3, kind: input, shape index: {}]   ;;  %s3177_s4 = inlined_call_operand.vmem [shape: bf16[128,384], index: 4, kind: input, shape index: {}]   ;;  %s3178_s5 = inlined_call_operand.vmem [shape: f32[1,128], index: 5, kind: input, shape index: {}]   ;;  %s3179_s6 = inlined_call_operand.vmem [shape: bf16[128,128], index: 6, kind: input, shape index: {}]   ;;  %s3180_s7 = inlined_call_operand.vmem [shape: f32[1,128], index: 7, kind: input, shape index: {}]   ;;  %s3181_s8 = inlined_call_operand.vmem [shape: f32[8,128], index: 8, kind: output, shape index: {}]  }
   0x1   :  { %3188 = sst [smem:[#allocation9_spill]] %s3180_s7  ;;  %s13_s29 = sshll.u32 %s3173_s0, 4  ;;  %s14_s29 = int_to_ptr.vmem [resolvable:$true] %s13_s29 }
   0x2   :  { %3189 = sst [smem:[#allocation10_spill]] %s3181_s8  ;;  %s2245_s30 = scalar_lea.vmem %s14_s29, 16 }
   0x3   :  { %p2246_p0 = scmp.ne.s32.totalorder %s14_s29, %s2245_s30  ;;  %p2250_p1 = scmp.lt.s32.totalorder %s14_s29, %s14_s29 }
   0x4   :  { %p2251_p2 = scmp.lt.s32.totalorder %s2245_s30, %s2245_s30 }
   0x6   :  { %p2252_p3 = por %p2251_p2, %p2250_p1 }
   0x8   :  { %p2253_p4 = pnand %p2252_p3, %p2246_p0 }
   0xa   :  { %2256 = shalt.err (!%p2253_p4)  }
   0xb   :  { %s2259_s9 = smov [#allocation5]  }
   0xc   :  { %16 = dma.vmem_to_smem %s14_s29, 16, %s2259_s9, [#allocation4] }
   0xd   :  { %2257 = dma.done.wait [#allocation4], 16 }
   0xe   :  { %2258 = vsyncadd [#allocation4], 4294967280 }
   0xf   :  { %18 = sfence }
  0x10   :  { %s1703_s10 = sld [smem:[#allocation5 + $0x6]]  ;;  %v2089_v0 = vld [vmem:[%s3175_s2 + $0x4c] ss:$12 sps:$4 sm:$0xff]   ;;  %v2091_v1 = vld [vmem:[%s3175_s2 + $0x48] ss:$12 sps:$4 sm:$0xff]   ;;  %vm34_vm0 = vcmask 523264  }
  0x11   :  { %s1699_s11 = sld [smem:[#allocation5 + $0x7]]  ;;  %366 = vmatprep.subr.bf16.mxu0 %v2089_v0  ;;  %v3186_v2 = vmov 0.0   ;;  %v2092_v3 = vld [vmem:[%s3175_s2 + $0x34] ss:$12 sps:$4 sm:$0xff]   ;;  %v2094_v4 = vld [vmem:[%s3175_s2 + $0x30] ss:$12 sps:$4 sm:$0xff]  }
  0x12   :  { %s2318_s15 = sld [smem:[#allocation5 + $0xe]]  ;;  %36 = vst.msk [vmem:[#allocation2 + $0x8] sm:$0xff] %vm34_vm0, %v3186_v2  ;;  %35 = vst.msk [vmem:[#allocation2] sm:$0xff] %vm34_vm0, %v3186_v2  ;;  %367 = vmatpush1.bf16.msra.mxu0 %v2091_v1  ;;  %v2095_v5 = vld [vmem:[%s3175_s2 + $0x1c] ss:$12 sps:$4 sm:$0xff]   ;;  %v3184_v13 = vmov 0  }
  0x13   :  { %s2320_s16 = sld [smem:[#allocation5 + $0xf]]  ;;  %37 = vst.msk [vmem:[#allocation2 + $0x10] sm:$0xff] %vm34_vm0, %v3186_v2  ;;  %38 = vst.msk [vmem:[#allocation2 + $0x18] sm:$0xff] %vm34_vm0, %v3186_v2  ;;  %368 = vmatprep.subr.bf16.mxu0 %v2092_v3  ;;  %v2097_v6 = vld [vmem:[%s3175_s2 + $0x18] ss:$12 sps:$4 sm:$0xff]   ;;  %390 = vmatprep.mubr.bf16.mxu0 %v3184_v13  ;;  %vm47_vm1 = vcmask 253952  }
  0x14   :  { %39 = vst.msk [vmem:[#allocation2 + $0x20] sm:$0xff] %vm34_vm0, %v3186_v2  ;;  %40 = vst.msk [vmem:[#allocation2 + $0x28] sm:$0xff] %vm34_vm0, %v3186_v2  ;;  %s1709_s19 = sld [smem:[#allocation5 + $0xd]]  ;;  %v2098_v8 = vld [vmem:[%s3175_s2 + $0x50] ss:$12 sps:$4 sm:$0xff]   ;;  %vm55_vm2 = vcmask 516352  }
  0x15   :  { %41 = vst.msk [vmem:[#allocation2 + $0x30] sm:$0xff] %vm34_vm0, %v3186_v2  ;;  %42 = vst.msk [vmem:[#allocation2 + $0x38] sm:$0xff] %vm34_vm0, %v3186_v2  ;;  %s1707_s22 = sld [smem:[#allocation5 + $0x5]]  ;;  %v2099_v11 = vld [vmem:[%s3175_s2 + $0x4] ss:$12 sps:$4 sm:$0xff]   ;;  %1888 = vmatprep.subr.bf16.mxu1 %v2098_v8  ;;  %vm2263_vm3 = vmmov 0  }
  0x16   :  { %s2350_s27 = scalar_lea.vmem %s3174_s1, %s1703_s10  ;;  %s1713_s28 = sld [smem:[#allocation5 + $0xc]]  ;;  %369 = vmatpush1.bf16.msra.mxu0 %v2094_v4  ;;  %1889 = vmatpush3.bf16.msra.mxu1 %v2098_v8  ;;  %v2101_v14 = vld [vmem:[%s3175_s2] ss:$12 sps:$4 sm:$0xff]   ;;  %v2102_v16 = vld [vmem:[%s3175_s2 + $0x38] ss:$12 sps:$4 sm:$0xff]  }
  0x17   :  { %v75_v7 = vld [vmem:[%s2350_s27] sm:$0x1]  ;;  %s2359_s13 = scalar_lea.vmem %s3174_s1, %s1699_s11  ;;  %s2361_s0 = sld [smem:[#allocation5 + $0x4]]  ;;  %370 = vmatprep.subr.bf16.mxu0 %v2095_v5  ;;  %1890 = vmatprep.subr.bf16.mxu1 %v2102_v16  ;;  %v2449_v20 = vld [vmem:[%s3177_s4 + $0xac] ss:$12 sps:$4 sm:$0xff]  }
  0x18   :  { %s3182_s10 = smov 32   ;;  %v50_v9 = vld [vmem:[%s2359_s13] sm:$0x1]  ;;  %s2372_s21 = scalar_lea.vmem %s3174_s1, %s2318_s15  ;;  %v2109_v34 = vld [vmem:[%s3175_s2 + $0x8] ss:$12 sps:$4 sm:$0xff]  }
  0x19   :  { %77 = vrot.lane.b32.xlu1 %v75_v7, %s3182_s10  ;;  %s2374_s23 = sld [smem:[#allocation5 + $0xb]]  ;;  %52 = vrot.lane.b32.xlu0 %v50_v9, %s3182_s10  ;;  %v87_v10 = vld [vmem:[%s2372_s21] sm:$0x1]  ;;  %s2382_s25 = scalar_lea.vmem %s3174_s1, %s2320_s16  ;;  %v2547_v57 = vld [vmem:[%s3177_s4 + $0xa8] ss:$12 sps:$4 sm:$0xff]  }
  0x1a   :  { %s1715_s26 = sld [smem:[#allocation5 + $0x3]]  ;;  %v63_v12 = vld [vmem:[%s2382_s25] sm:$0x1]  ;;  %s2391_s12 = scalar_lea.vmem %s3174_s1, %s1709_s19  ;;  %371 = vmatpush1.bf16.msra.mxu0 %v2097_v6  ;;  %1891 = vmatpush3.bf16.msra.mxu1 %v2102_v16  ;;  %v2562_v62 = vld [vmem:[%s3177_s4 + $0x90] ss:$12 sps:$4 sm:$0xff]  }
  0x1b   :  { %s1721_s14 = sld [smem:[#allocation5 + $0xa]]  ;;  %s2397_s18 = scalar_lea.vmem %s3174_s1, %s1707_s22  ;;  %v111_v15 = vld [vmem:[%s2391_s12] sm:$0x1]  ;;  %372 = vmatprep.subr.bf16.mxu0 %v2099_v11  ;;  %v2570_v63 = vld [vmem:[%s3177_s4 + $0x7c] ss:$12 sps:$4 sm:$0xff]  }
  0x1c   :  { %s2399_s20 = sld [smem:[#allocation5 + $0x2]]  ;;  %s2405_s24 = scalar_lea.vmem %s3174_s1, %s1713_s28  ;;  %v99_v17 = vld [vmem:[%s2397_s18] sm:$0x1]  ;;  %v2577_v5 = vld [vmem:[%s3177_s4 + $0x78] ss:$12 sps:$4 sm:$0xff]  }
  0x1d   :  { %89 = vrot.lane.b32.xlu1 %v87_v10, %s3182_s10  ;;  %s2407_s29 = sld [smem:[#allocation5 + $0x9]]  ;;  %65 = vrot.lane.b32.xlu0 %v63_v12, %s3182_s10  ;;  %s2418_s16 = scalar_lea.vmem %s3174_s1, %s2361_s0  ;;  %v135_v21 = vld [vmem:[%s2405_s24] sm:$0x1]  ;;  %v2584_v7 = vld [vmem:[%s3177_s4 + $0x64] ss:$12 sps:$4 sm:$0xff]  }
  0x1e   :  { %s1723_s17 = sld [smem:[#allocation5 + $0x1]]  ;;  %s3190_s19 = smov 32   ;;  %373 = vmatpush1.bf16.msra.mxu0 %v2101_v14  ;;  %v123_v23 = vld [vmem:[%s2418_s16] sm:$0x1]  ;;  %v2589_v8 = vld [vmem:[%s3177_s4 + $0xb0] ss:$12 sps:$4 sm:$0xff]  }
  0x1f   :  { %s2428_s30 = scalar_lea.vmem %s3174_s1, %s2374_s23  ;;  %s1728_s15 = sld [smem:[#allocation5 + $0x8]]  ;;  %690 = vmatprep.subr.bf16.mxu0 %v2449_v20  ;;  %v2105_v26 = vld [vmem:[%s3175_s2 + $0x20] ss:$12 sps:$4 sm:$0xff]   ;;  %v2612_v14 = vld [vmem:[%s3177_s4 + $0x98] ss:$12 sps:$4 sm:$0xff]  }
  0x20   :  { %s2433_s0 = scalar_lea.vmem %s3174_s1, %s1715_s26  ;;  %s2435_s9 = sld [smem:[#allocation5]]  ;;  %v132_v18 = vld [vmem:[%s2428_s30] sm:$0x1]  ;;  %1892 = vmatprep.subr.bf16.mxu1 %v2105_v26  ;;  %v2606_v12 = vld [vmem:[%s3177_s4 + $0x4c] ss:$12 sps:$4 sm:$0xff]  }
  0x21   :  { %113 = vrot.lane.b32.xlu1 %v111_v15, %s3190_s19  ;;  %s2442_s28 = scalar_lea.vmem %s3174_s1, %s1721_s14  ;;  %133 = vst.msk [vmem:[#allocation2 + $0x19] sm:$0x1] %vm47_vm1, %v132_v18  ;;  %v120_v19 = vld [vmem:[%s2433_s0] sm:$0x1]  ;;  %101 = vrot.lane.b32.xlu0 %v99_v17, %s3190_s19 }
  0x22   :  { %s2457_s7 = scalar_lea.vmem %s3174_s1, %s2399_s20  ;;  %v108_v22 = vld [vmem:[%s2442_s28] sm:$0x1]  ;;  %121 = vst.msk [vmem:[#allocation2 + $0x18] sm:$0x1] %vm47_vm1, %v120_v19  ;;  %1893 = vmatpush3.bf16.msra.mxu1 %v2105_v26  ;;  %v2620_v19 = vld [vmem:[%s3177_s4 + $0x48] ss:$12 sps:$4 sm:$0xff]  }
  0x23   :  { %s2466_s23 = scalar_lea.vmem %s3174_s1, %s2407_s29  ;;  %109 = vst.msk [vmem:[#allocation2 + $0x11] sm:$0x1] %vm47_vm1, %v108_v22  ;;  %v96_v24 = vld [vmem:[%s2457_s7] sm:$0x1]  ;;  %1894 = vmatprep.subr.bf16.mxu1 %v2109_v34  ;;  %v2655_v26 = vld [vmem:[%s3177_s4 + $0x68] ss:$12 sps:$4 sm:$0xff]  }
  0x24   :  { %s2474_s26 = scalar_lea.vmem %s3174_s1, %s1723_s17  ;;  %v84_v25 = vld [vmem:[%s2466_s23] sm:$0x1]  ;;  %97 = vst.msk [vmem:[#allocation2 + $0x10] sm:$0x1] %vm47_vm1, %v96_v24  ;;  %v2642_v24 = vld [vmem:[%s3177_s4 + $0x30] ss:$12 sps:$4 sm:$0xff]  }
  0x25   :  { %137 = vrot.lane.b32.xlu1 %v135_v21, %s3190_s19  ;;  %s2485_s8 = scalar_lea.vmem %s3174_s1, %s1728_s15  ;;  %v72_v27 = vld [vmem:[%s2474_s26] sm:$0x1]  ;;  %85 = vst.msk [vmem:[#allocation2 + $0x9] sm:$0x1] %vm47_vm1, %v84_v25  ;;  %125 = vrot.lane.b32.xlu0 %v123_v23, %s3190_s19  ;;  %v2649_v25 = vld [vmem:[%s3177_s4 + $0x1c] ss:$12 sps:$4 sm:$0xff]  }
  0x26   :  { %v159_v28 = vld [vmem:[%s2428_s30] sm:$0x1]  ;;  %s2495_s10 = scalar_lea.vmem %s3174_s1, %s2435_s9  ;;  %73 = vst.msk [vmem:[#allocation2 + $0x8] sm:$0x1] %vm47_vm1, %v72_v27  ;;  %1895 = vmatpush3.bf16.msra.mxu1 %v2109_v34  ;;  %v2691_v34 = vld [vmem:[%s3177_s4 + $0x38] ss:$12 sps:$4 sm:$0xff]  }
  0x27   :  { %v60_v29 = vld [vmem:[%s2485_s8] sm:$0x1]  ;;  %1904 = vmatprep.subr.bf16.mxu1 %v3186_v2  ;;  %s3198_s17 = sld [smem:[#allocation10_spill]] }
  0x28   :  { %v156_v30 = vld [vmem:[%s2405_s24] sm:$0x1]  ;;  %61 = vst.msk [vmem:[#allocation2 + $0x1] sm:$0x1] %vm47_vm1, %v60_v29  ;;  %v2662_v29 = vld [vmem:[%s3177_s4 + $0x18] ss:$12 sps:$4 sm:$0xff]  }
  0x29   :  { %v147_v31 = vld [vmem:[%s2433_s0] sm:$0x1]  ;;  %157 = vst.msk [vmem:[#allocation2 + $0x21] sm:$0x1] %vm47_vm1, %v156_v30  ;;  %161 = vrot.lane.b32.xlu1 %v159_v28, %s3190_s19 }
  0x2a   :  { %v46_v32 = vld [vmem:[%s2495_s10] sm:$0x1]  ;;  %149 = vrot.lane.b32.xlu0 %v147_v31, %s3190_s19  ;;  %v2668_v31 = vld [vmem:[%s3177_s4 + $0x4] ss:$12 sps:$4 sm:$0xff]  }
  0x2b   :  { %v144_v33 = vld [vmem:[%s2418_s16] sm:$0x1]  ;;  %48 = vst.msk [vmem:[#allocation2] sm:$0x1] %vm47_vm1, %v46_v32  ;;  %v2674_v32 = vld [vmem:[%s3177_s4 + $0x50] ss:$12 sps:$4 sm:$0xff]  }
  0x2c   :  { %145 = vst.msk [vmem:[#allocation2 + $0x20] sm:$0x1] %vm47_vm1, %v144_v33  ;;  %v183_v35 = vld [vmem:[%s2442_s28] sm:$0x1] }
  0x2d   :  { %v180_v36 = vld [vmem:[%s2391_s12] sm:$0x1]  ;;  %185 = vrot.lane.b32.xlu1 %v183_v35, %s3190_s19 }
  0x2e   :  { %v168_v37 = vld [vmem:[%s2397_s18] sm:$0x1]  ;;  %181 = vst.msk [vmem:[#allocation2 + $0x29] sm:$0x1] %vm47_vm1, %v180_v36  ;;  %v2712_v36 = vld [vmem:[%s3177_s4 + $0x8] ss:$12 sps:$4 sm:$0xff]  }
  0x2f   :  { %v171_v38 = vld [vmem:[%s2457_s7] sm:$0x1]  ;;  %169 = vst.msk [vmem:[#allocation2 + $0x28] sm:$0x1] %vm47_vm1, %v168_v37  ;;  %v267_v37 = vlaneseq }
  0x30   :  { %v204_v39 = vld [vmem:[%s2372_s21] sm:$0x1]  ;;  %173 = vrot.lane.b32.xlu0 %v171_v38, %s3190_s19 }
  0x31   :  { %v192_v40 = vld [vmem:[%s2350_s27] sm:$0x1]  ;;  %205 = vst.msk [vmem:[#allocation2 + $0x31] sm:$0x1] %vm47_vm1, %v204_v39  ;;  %v268_v38 = vshrl.u32 %v267_v37, 7 }
  0x32   :  { %193 = vst.msk [vmem:[#allocation2 + $0x30] sm:$0x1] %vm47_vm1, %v192_v40  ;;  %v207_v41 = vld [vmem:[%s2466_s23] sm:$0x1] }
  0x33   :  { %v228_v42 = vld [vmem:[%s2382_s25] sm:$0x1]  ;;  %209 = vrot.lane.b32.xlu1 %v207_v41, %s3190_s19  ;;  %v269_v39 = vsub.s32 0, %v268_v38 }
  0x34   :  { %v216_v43 = vld [vmem:[%s2359_s13] sm:$0x1]  ;;  %229 = vst.msk [vmem:[#allocation2 + $0x39] sm:$0x1] %vm47_vm1, %v228_v42  ;;  %v273_v42 = vsub.s32 1, %v268_v38 }
  0x35   :  { %v195_v44 = vld [vmem:[%s2474_s26] sm:$0x1]  ;;  %217 = vst.msk [vmem:[#allocation2 + $0x38] sm:$0x1] %vm47_vm1, %v216_v43  ;;  %v277_v43 = vsub.s32 2, %v268_v38 }
  0x36   :  { %197 = vrot.lane.b32.xlu0 %v195_v44, %s3190_s19  ;;  %v231_v45 = vld [vmem:[%s2485_s8] sm:$0x1] }
  0x37   :  { %v219_v46 = vld [vmem:[%s2495_s10] sm:$0x1]  ;;  %233 = vrot.lane.b32.xlu1 %v231_v45, %s3190_s19 }
  0x38   :  { %v2553_v59 = vld [vmem:[%s3177_s4 + $0x94] ss:$12 sps:$4 sm:$0xff]  }
  0x39   :  { %v2598_v11 = vld [vmem:[%s3177_s4 + $0x60] ss:$12 sps:$4 sm:$0xff]  }
  0x3a   :  { %221 = vrot.lane.b32.xlu0 %v219_v46, %s3190_s19  ;;  %v2627_v22 = vld [vmem:[%s3177_s4 + $0x34] ss:$12 sps:$4 sm:$0xff]  }
  0x3b   :  { %v2633_v23 = vld [vmem:[%s3177_s4 + $0x80] ss:$12 sps:$4 sm:$0xff]  }
  0x3c   :  { %v2683_v33 = vld [vmem:[%s3177_s4] ss:$12 sps:$4 sm:$0xff]  }
  0x3d   :  { %v2701_v35 = vld [vmem:[%s3177_s4 + $0x20] ss:$12 sps:$4 sm:$0xff]  }
  0x3e   :  { %v265_v40 = vld [vmem:[%s3176_s3] sm:$0x7]  ;;  %s3197_s3 = sld [smem:[#allocation9_spill]] }
  0x3f   :  { %v270_v45 = vrot.slane %v265_v40, %v269_v39 }
  0x8b   :  { %v78_v47 = vpop.permute.xlu1 %77  ;;  %v53_v48 = vpop.permute.xlu0 %52 }
  0x8c   :  { %80 = vst.msk [vmem:[#allocation2 + $0x8] sm:$0x1] %vm55_vm2, %v78_v47  ;;  %56 = vst.msk [vmem:[#allocation2] sm:$0x1] %vm55_vm2, %v53_v48  ;;  %v274_v47 = vrot.slane %v265_v40, %v273_v42 }
  0x8f   :  { %v90_v49 = vpop.permute.xlu1 %89  ;;  %v66_v50 = vpop.permute.xlu0 %65 }
  0x90   :  { %92 = vst.msk [vmem:[#allocation2 + $0x9] sm:$0x1] %vm55_vm2, %v90_v49  ;;  %68 = vst.msk [vmem:[#allocation2 + $0x1] sm:$0x1] %vm55_vm2, %v66_v50  ;;  %v2756_v49 = vrot.slane %v265_v40, %v277_v43 }
  0x93   :  { %v114_v51 = vpop.permute.xlu1 %113  ;;  %v102_v52 = vpop.permute.xlu0 %101 }
  0x94   :  { %116 = vst.msk [vmem:[#allocation2 + $0x11] sm:$0x1] %vm55_vm2, %v114_v51  ;;  %104 = vst.msk [vmem:[#allocation2 + $0x10] sm:$0x1] %vm55_vm2, %v102_v52 }
  0x97   :  { %v138_v53 = vpop.permute.xlu1 %137  ;;  %v238_v54 = vld [vmem:[#allocation2 + $0x8] sm:$0xff]  ;;  %v126_v55 = vpop.permute.xlu0 %125  ;;  %v237_v56 = vld [vmem:[#allocation2] sm:$0xff] }
  0x98   :  { %140 = vst.msk [vmem:[#allocation2 + $0x19] sm:$0x1] %vm55_vm2, %v138_v53  ;;  %128 = vst.msk [vmem:[#allocation2 + $0x18] sm:$0x1] %vm55_vm2, %v126_v55  ;;  %v245_v58 = vpack.c.bf16 %v238_v54, %v237_v56 }
  0x9a   :  { %1741 = vmatmul.mubr.msk.bf16.vlgmr.msra.gmra.mxu0 %vm34_vm0, %v245_v58  ;;  %1896 = vmatprep.mubr.msk.bf16.mxu1 %vm34_vm0, %v245_v58 }
  0x9b   :  { %v162_v60 = vpop.permute.xlu1 %161  ;;  %691 = vmatpush1.bf16.msra.mxu0 %v2547_v57  ;;  %400 = vmatprep.mubr.bf16.mxu0 %v3184_v13  ;;  %v239_v3 = vld [vmem:[#allocation2 + $0x10] sm:$0xff] }
  0x9c   :  { %164 = vst.msk [vmem:[#allocation2 + $0x21] sm:$0x1] %vm55_vm2, %v162_v60  ;;  %v150_v61 = vpop.permute.xlu0 %149  ;;  %692 = vmatprep.subr.bf16.mxu0 %v2553_v59 }
  0x9d   :  { %152 = vst.msk [vmem:[#allocation2 + $0x20] sm:$0x1] %vm55_vm2, %v150_v61 }
  0x9f   :  { %v186_v0 = vpop.permute.xlu1 %185  ;;  %693 = vmatpush1.bf16.msra.mxu0 %v2562_v62  ;;  %v240_v4 = vld [vmem:[#allocation2 + $0x18] sm:$0xff] }
  0xa0   :  { %188 = vst.msk [vmem:[#allocation2 + $0x29] sm:$0x1] %vm55_vm2, %v186_v0  ;;  %694 = vmatprep.subr.bf16.mxu0 %v2570_v63  ;;  %v246_v6 = vpack.c.bf16 %v240_v4, %v239_v3 }
  0xa2   :  { %v174_v1 = vpop.permute.xlu0 %173  ;;  %1742 = vmatmul.mubr.msk.bf16.gmra.mxu0 %vm34_vm0, %v246_v6  ;;  %1897 = vmatmul.mubr.msk.bf16.vlgmr.msra.gmra.mxu1 %vm34_vm0, %v246_v6 }
  0xa3   :  { %176 = vst.msk [vmem:[#allocation2 + $0x28] sm:$0x1] %vm55_vm2, %v174_v1  ;;  %695 = vmatpush1.bf16.msra.mxu0 %v2577_v5  ;;  %410 = vmatprep.mubr.bf16.mxu0 %v3184_v13 }
  0xa4   :  { %696 = vmatprep.subr.bf16.mxu0 %v2584_v7  ;;  %1905 = vmatpush3.bf16.msra.mxu1 %v2589_v8  ;;  %v241_v17 = vld [vmem:[#allocation2 + $0x20] sm:$0xff] }
  0xa5   :  { %v210_v9 = vpop.permute.xlu1 %209  ;;  %1906 = vmatprep.subr.bf16.mxu1 %v3186_v2 }
  0xa6   :  { %212 = vst.msk [vmem:[#allocation2 + $0x31] sm:$0x1] %vm55_vm2, %v210_v9 }
  0xa7   :  { %697 = vmatpush1.bf16.msra.mxu0 %v2598_v11 }
  0xa8   :  { %v198_v10 = vpop.permute.xlu0 %197  ;;  %698 = vmatprep.subr.bf16.mxu0 %v2606_v12  ;;  %1907 = vmatpush3.bf16.msra.mxu1 %v2612_v14 }
  0xa9   :  { %200 = vst.msk [vmem:[#allocation2 + $0x30] sm:$0x1] %vm55_vm2, %v198_v10  ;;  %v234_v15 = vpop.permute.xlu1 %233  ;;  %1908 = vmatprep.subr.bf16.mxu1 %v3186_v2 }
  0xaa   :  { %236 = vst.msk [vmem:[#allocation2 + $0x39] sm:$0x1] %vm55_vm2, %v234_v15  ;;  %v242_v18 = vld [vmem:[#allocation2 + $0x28] sm:$0xff] }
  0xab   :  { %v247_v21 = vpack.c.bf16 %v242_v18, %v241_v17  ;;  %699 = vmatpush1.bf16.msra.mxu0 %v2620_v19 }
  0xac   :  { %v222_v16 = vpop.permute.xlu0 %221  ;;  %700 = vmatprep.subr.bf16.mxu0 %v2627_v22  ;;  %1909 = vmatpush3.bf16.msra.mxu1 %v2633_v23 }
  0xad   :  { %224 = vst.msk [vmem:[#allocation2 + $0x38] sm:$0x1] %vm55_vm2, %v222_v16  ;;  %1743 = vmatmul.mubr.msk.bf16.gmra.mxu0 %vm34_vm0, %v247_v21  ;;  %1900 = vmatprep.mubr.msk.bf16.mxu1 %vm34_vm0, %v247_v21 }
  0xae   :  { %420 = vmatprep.mubr.bf16.mxu0 %v3184_v13  ;;  %1910 = vmatprep.subr.bf16.mxu1 %v3186_v2 }
  0xaf   :  { %701 = vmatpush1.bf16.msra.mxu0 %v2642_v24 }
  0xb0   :  { %v243_v27 = vld [vmem:[#allocation2 + $0x30] sm:$0xff]  ;;  %702 = vmatprep.subr.bf16.mxu0 %v2649_v25  ;;  %1911 = vmatpush3.bf16.msra.mxu1 %v2655_v26 }
  0xb1   :  { %1912 = vmatprep.subr.bf16.mxu1 %v3186_v2 }
  0xb3   :  { %703 = vmatpush1.bf16.msra.mxu0 %v2662_v29 }
  0xb4   :  { %v244_v28 = vld [vmem:[#allocation2 + $0x38] sm:$0xff]  ;;  %704 = vmatprep.subr.bf16.mxu0 %v2668_v31  ;;  %1913 = vmatpush3.bf16.msra.mxu1 %v2674_v32 }
  0xb5   :  { %v248_v30 = vpack.c.bf16 %v244_v28, %v243_v27  ;;  %1914 = vmatprep.subr.bf16.mxu1 %v3186_v2 }
  0xb7   :  { %1744 = vmatmul.mubr.msk.bf16.gmra.mxu0 %vm34_vm0, %v248_v30  ;;  %1901 = vmatmul.mubr.msk.bf16.gmra.mxu1 %vm34_vm0, %v248_v30 }
  0xb8   :  { %722 = vmatprep.mubr.bf16.mxu0 %v3184_v13  ;;  %1920 = vmatprep.mubr.msk.bf16.mxu1 %vm2263_vm3, %v3186_v2 }
  0xb9   :  { %705 = vmatpush1.bf16.msra.mxu0 %v2683_v33  ;;  %1915 = vmatpush3.bf16.msra.mxu1 %v2691_v34 }
  0xba   :  { %798 = vmatprep.subr.bf16.mxu0 %v2449_v20  ;;  %1916 = vmatprep.subr.bf16.mxu1 %v3186_v2 }
  0xbd   :  { %1917 = vmatpush3.bf16.msra.mxu1 %v2701_v35 }
  0xbe   :  { %1918 = vmatprep.subr.bf16.mxu1 %v3186_v2 }
  0xbf   :  { %723 = vmatmul.mubr.bf16.vlgmr.msra.gmra.mxu0 %v3184_v13 }
  0xc0   :  { %799 = vmatpush1.bf16.msra.mxu0 %v2547_v57  ;;  %830 = vmatprep.mubr.bf16.mxu0 %v3184_v13 }
  0xc1   :  { %800 = vmatprep.subr.bf16.mxu0 %v2553_v59  ;;  %1919 = vmatpush3.bf16.msra.mxu1 %v2712_v36 }
  0xc2   :  { %1924 = vmatprep.subr.bf16.mxu1 %v3186_v2 }
  0xc4   :  { %801 = vmatpush1.bf16.msra.mxu0 %v2562_v62  ;;  %1921 = vmatmul.mubr.bf16.vlgmr.msra.gmra.mxu1 %v3184_v13 }
  0xc5   :  { %802 = vmatprep.subr.bf16.mxu0 %v2570_v63  ;;  %1925 = vmatpush3.bf16.msra.mxu1 %v2589_v8 }
  0xc6   :  { %1926 = vmatprep.subr.bf16.mxu1 %v3186_v2  ;;  %1940 = vmatprep.mubr.msk.bf16.mxu1 %vm2263_vm3, %v3186_v2 }
  0xc8   :  { %803 = vmatpush1.bf16.msra.mxu0 %v2577_v5 }
  0xc9   :  { %804 = vmatprep.subr.bf16.mxu0 %v2584_v7  ;;  %1927 = vmatpush3.bf16.msra.mxu1 %v2612_v14 }
  0xca   :  { %1928 = vmatprep.subr.bf16.mxu1 %v3186_v2 }
  0xcc   :  { %805 = vmatpush1.bf16.msra.mxu0 %v2598_v11 }
  0xcd   :  { %806 = vmatprep.subr.bf16.mxu0 %v2606_v12  ;;  %1929 = vmatpush3.bf16.msra.mxu1 %v2633_v23 }
  0xce   :  { %1930 = vmatprep.subr.bf16.mxu1 %v3186_v2 }
  0xd0   :  { %807 = vmatpush1.bf16.msra.mxu0 %v2620_v19 }
  0xd1   :  { %808 = vmatprep.subr.bf16.mxu0 %v2627_v22  ;;  %1931 = vmatpush3.bf16.msra.mxu1 %v2655_v26 }
  0xd2   :  { %1932 = vmatprep.subr.bf16.mxu1 %v3186_v2 }
  0xd4   :  { %809 = vmatpush1.bf16.msra.mxu0 %v2642_v24 }
  0xd5   :  { %810 = vmatprep.subr.bf16.mxu0 %v2649_v25  ;;  %1933 = vmatpush3.bf16.msra.mxu1 %v2674_v32 }
  0xd6   :  { %1934 = vmatprep.subr.bf16.mxu1 %v3186_v2 }
  0xd8   :  { %811 = vmatpush1.bf16.msra.mxu0 %v2662_v29 }
  0xd9   :  { %812 = vmatprep.subr.bf16.mxu0 %v2668_v31  ;;  %1935 = vmatpush3.bf16.msra.mxu1 %v2691_v34 }
  0xda   :  { %1936 = vmatprep.subr.bf16.mxu1 %v3186_v2 }
  0xdc   :  { %813 = vmatpush1.bf16.msra.mxu0 %v2683_v33 }
  0xdd   :  { %906 = vmatprep.subr.bf16.mxu0 %v2449_v20  ;;  %1937 = vmatpush3.bf16.msra.mxu1 %v2701_v35 }
  0xde   :  { %1938 = vmatprep.subr.bf16.mxu1 %v3186_v2 }
  0xe1   :  { %1939 = vmatpush3.bf16.msra.mxu1 %v2712_v36 }
  0xe2   :  { %1944 = vmatprep.subr.bf16.mxu1 %v3186_v2 }
 0x15a   :  { %v392_v41 = vpop.f32.mrf.mxu0 }
 0x15c   :  { %v394_v44 = vpop.f32.mrf.mxu0 }
 0x15e   :  { %v396_v46 = vpop.f32.mrf.mxu0 }
 0x15f   :  { %v2754_v48 = vadd.f32 %v396_v46, %v270_v45 }
 0x160   :  { %v398_v50 = vpop.f32.mrf.mxu0 }
 0x161   :  { %v2758_v51 = vadd.f32 %v398_v50, %v274_v47 }
 0x162   :  { %v402_v52 = vpop.f32.mrf.mxu0  ;;  %v1898_v53 = vpop.f32.mrf.mxu1 }
 0x163   :  { %v2760_v54 = vadd.f32 %v402_v52, %v270_v45  ;;  %v2763_v55 = vadd.f32 %v1898_v53, %v2756_v49 }
 0x164   :  { %v404_v56 = vpop.f32.mrf.mxu0  ;;  %v465_v58 = vpop.f32.mrf.mxu1 }
 0x165   :  { %v2765_v60 = vadd.f32 %v404_v56, %v274_v47 }
 0x166   :  { %v406_v61 = vpop.f32.mrf.mxu0  ;;  %v1899_v0 = vpop.f32.mrf.mxu1 }
 0x167   :  { %v2767_v1 = vadd.f32 %v406_v61, %v270_v45  ;;  %v2770_v3 = vadd.f32 %v1899_v0, %v2756_v49 }
 0x168   :  { %v408_v4 = vpop.f32.mrf.mxu0  ;;  %v468_v6 = vpop.f32.mrf.mxu1 }
 0x169   :  { %v2772_v9 = vadd.f32 %v408_v4, %v274_v47  ;;  %v2775_v10 = vadd.f32 %v468_v6, %v2756_v49  ;;  %v393_v6 = vadd.f32 %v392_v41, %v270_v45 }
 0x16d   :  { %v412_v15 = vpop.f32.mrf.mxu0 }
 0x16e   :  { %v2777_v16 = vadd.f32 %v412_v15, %v270_v45 }
 0x16f   :  { %v414_v17 = vpop.f32.mrf.mxu0 }
 0x170   :  { %v2779_v18 = vadd.f32 %v414_v17, %v274_v47 }
 0x171   :  { %v416_v21 = vpop.f32.mrf.mxu0 }
 0x172   :  { %v2781_v27 = vadd.f32 %v416_v21, %v270_v45 }
 0x173   :  { %v418_v28 = vpop.f32.mrf.mxu0 }
 0x174   :  { %v2783_v30 = vadd.f32 %v418_v28, %v274_v47 }
 0x177   :  { %v422_v37 = vpop.f32.mrf.mxu0  ;;  %v1902_v38 = vpop.f32.mrf.mxu1 }
 0x178   :  { %v2785_v39 = vadd.f32 %v422_v37, %v270_v45  ;;  %v2788_v40 = vadd.f32 %v1902_v38, %v2756_v49 }
 0x179   :  { %v424_v42 = vpop.f32.mrf.mxu0  ;;  %v481_v43 = vpop.f32.mrf.mxu1 }
 0x17a   :  { %v2790_v46 = vadd.f32 %v424_v42, %v274_v47  ;;  %v2793_v50 = vadd.f32 %v481_v43, %v2756_v49  ;;  %v395_v43 = vadd.f32 %v394_v44, %v274_v47 }
 0x17b   :  { %v426_v52 = vpop.f32.mrf.mxu0  ;;  %v1903_v53 = vpop.f32.mrf.mxu1 }
 0x17c   :  { %v2795_v56 = vadd.f32 %v426_v52, %v270_v45  ;;  %v2798_v61 = vadd.f32 %v1903_v53, %v2756_v49 }
 0x17d   :  { %v428_v0 = vpop.f32.mrf.mxu0  ;;  %v484_v4 = vpop.f32.mrf.mxu1 }
 0x17e   :  { %3191 = vst [vmem:[#allocation7_spill] sm:$0xff] %v2795_v56  ;;  %3192 = vst [vmem:[#allocation8_spill] sm:$0xff] %v2798_v61  ;;  %v2800_v15 = vadd.f32 %v428_v0, %v274_v47  ;;  %v2803_v17 = vadd.f32 %v484_v4, %v2756_v49 }
 0x17f   :  { %v724_v21 = vpop.f32.mrf.mxu0 }
 0x180   :  { %v771_v28 = vadd.f32 %v724_v21, %v393_v6  ;;  %v2808_v6 = vld [vmem:[%s3178_s5] ss:$0 sm:$0xff] }
 0x181   :  { %v726_v37 = vpop.f32.mrf.mxu0 }
 0x182   :  { %v1774_v38 = vmul.f32 -1.442695, %v771_v28  ;;  %v778_v13 = vadd.f32 %v726_v37, %v395_v43  ;;  %v466_v28 = vadd.f32 %v465_v58, %v2756_v49  ;;  %v3194_v49 = vmov 0  }
 0x183   :  { %v728_v42 = vpop.f32.mrf.mxu0 }
 0x184   :  { %2145 = vpow2.f32 %v1774_v38  ;;  %v765_v2 = vpop.f32.mrf.mxu1  ;;  %v1775_v53 = vmul.f32 -1.442695, %v778_v13 }
 0x185   :  { %v729_v52 = vpop.f32.mrf.mxu0  ;;  %v785_v44 = vadd.f32 %v2808_v6, %v765_v2  ;;  %v3193_v2 = vmov 0.0  }
 0x186   :  { %v1922_v61 = vpop.f32.mrf.mxu1  ;;  %2147 = vpow2.f32 %v1775_v53 }
 0x188   :  { %v768_v56 = vpop.f32.mrf.mxu1 }
 0x18a   :  { %v1923_v41 = vpop.f32.mrf.mxu1 }
 0x191   :  { %v2146_v45 = vpop.eup %2145 }
 0x192   :  { %v775_v0 = vadd.f32 1.0, %v2146_v45 }
 0x193   :  { %v2148_v4 = vpop.eup %2147 }
 0x194   :  { %2149 = vrcp.f32 %v775_v0  ;;  %v782_v21 = vadd.f32 1.0, %v2148_v4 }
 0x196   :  { %2151 = vrcp.f32 %v782_v21 }
 0x1a1   :  { %v2150_v47 = vpop.eup %2149 }
 0x1a2   :  { %v786_v13 = vmul.f32 %v2150_v47, %v785_v44 }
 0x1a3   :  { %v2152_v61 = vpop.eup %2151 }
 0x1a4   :  { %v787_v56 = vadd.f32 %v786_v13, %v466_v28  ;;  %v789_v37 = vsub.f32 1.0, %v2152_v61  ;;  %v791_v43 = vmul.f32 0.0, %v2152_v61 }
 0x1a6   :  { %2153 = vtanh.f32 %v787_v56 }
 0x1b3   :  { %v2154_v38 = vpop.eup %2153 }
 0x1b4   :  { %v790_v42 = vmul.f32 %v2154_v38, %v789_v37 }
 0x1b6   :  { %v2812_v52 = vadd.f32 %v791_v43, %v790_v42 }
 0x1b8   :  { %v797_v53 = vpack.c.bf16 %v2812_v52, %v2812_v52 }
 0x1ba   :  { %831 = vmatmul.mubr.bf16.vlgmr.msra.gmra.mxu0 %v797_v53  ;;  %1941 = vmatmul.mubr.bf16.vlgmr.msra.gmra.mxu1 %v797_v53 }
 0x1bb   :  { %907 = vmatpush1.bf16.msra.mxu0 %v2547_v57  ;;  %1945 = vmatpush3.bf16.msra.mxu1 %v2589_v8 }
 0x1bc   :  { %908 = vmatprep.subr.bf16.mxu0 %v2553_v59  ;;  %1946 = vmatprep.subr.bf16.mxu1 %v3193_v2 }
 0x1bd   :  { %938 = vmatprep.mubr.bf16.mxu0 %v3194_v49  ;;  %1960 = vmatprep.mubr.msk.bf16.mxu1 %vm2263_vm3, %v3193_v2 }
 0x1bf   :  { %909 = vmatpush1.bf16.msra.mxu0 %v2562_v62  ;;  %1947 = vmatpush3.bf16.msra.mxu1 %v2612_v14 }
 0x1c0   :  { %910 = vmatprep.subr.bf16.mxu0 %v2570_v63  ;;  %1948 = vmatprep.subr.bf16.mxu1 %v3193_v2 }
 0x1c3   :  { %911 = vmatpush1.bf16.msra.mxu0 %v2577_v5  ;;  %1949 = vmatpush3.bf16.msra.mxu1 %v2633_v23 }
 0x1c4   :  { %912 = vmatprep.subr.bf16.mxu0 %v2584_v7  ;;  %1950 = vmatprep.subr.bf16.mxu1 %v3193_v2 }
 0x1c7   :  { %913 = vmatpush1.bf16.msra.mxu0 %v2598_v11  ;;  %1951 = vmatpush3.bf16.msra.mxu1 %v2655_v26 }
 0x1c8   :  { %914 = vmatprep.subr.bf16.mxu0 %v2606_v12  ;;  %1952 = vmatprep.subr.bf16.mxu1 %v3193_v2 }
 0x1cb   :  { %915 = vmatpush1.bf16.msra.mxu0 %v2620_v19  ;;  %1953 = vmatpush3.bf16.msra.mxu1 %v2674_v32 }
 0x1cc   :  { %916 = vmatprep.subr.bf16.mxu0 %v2627_v22  ;;  %1954 = vmatprep.subr.bf16.mxu1 %v3193_v2 }
 0x1cf   :  { %917 = vmatpush1.bf16.msra.mxu0 %v2642_v24  ;;  %1955 = vmatpush3.bf16.msra.mxu1 %v2691_v34 }
 0x1d0   :  { %918 = vmatprep.subr.bf16.mxu0 %v2649_v25  ;;  %1956 = vmatprep.subr.bf16.mxu1 %v3193_v2 }
 0x1d3   :  { %919 = vmatpush1.bf16.msra.mxu0 %v2662_v29  ;;  %1957 = vmatpush3.bf16.msra.mxu1 %v2701_v35 }
 0x1d4   :  { %920 = vmatprep.subr.bf16.mxu0 %v2668_v31  ;;  %1958 = vmatprep.subr.bf16.mxu1 %v3193_v2 }
 0x1d7   :  { %921 = vmatpush1.bf16.msra.mxu0 %v2683_v33  ;;  %1959 = vmatpush3.bf16.msra.mxu1 %v2712_v36 }
 0x1d8   :  { %1014 = vmatprep.subr.bf16.mxu0 %v2449_v20  ;;  %1964 = vmatprep.subr.bf16.mxu1 %v3193_v2 }
 0x27a   :  { %v832_v58 = vpop.f32.mrf.mxu0  ;;  %v873_v41 = vpop.f32.mrf.mxu1 }
 0x27b   :  { %v879_v45 = vadd.f32 %v832_v58, %v2754_v48  ;;  %v893_v53 = vadd.f32 %v2808_v6, %v873_v41 }
 0x27c   :  { %v834_v0 = vpop.f32.mrf.mxu0  ;;  %v1942_v4 = vpop.f32.mrf.mxu1 }
 0x27d   :  { %v1776_v21 = vmul.f32 -1.442695, %v879_v45  ;;  %v886_v56 = vadd.f32 %v834_v0, %v2758_v51 }
 0x27e   :  { %v836_v44 = vpop.f32.mrf.mxu0  ;;  %v876_v47 = vpop.f32.mrf.mxu1 }
 0x27f   :  { %2155 = vpow2.f32 %v1776_v21  ;;  %v1777_v61 = vmul.f32 -1.442695, %v886_v56 }
 0x280   :  { %v837_v28 = vpop.f32.mrf.mxu0  ;;  %v1943_v13 = vpop.f32.mrf.mxu1 }
 0x281   :  { %2157 = vpow2.f32 %v1777_v61 }
 0x28c   :  { %v2156_v37 = vpop.eup %2155 }
 0x28d   :  { %v883_v38 = vadd.f32 1.0, %v2156_v37 }
 0x28e   :  { %v2158_v42 = vpop.eup %2157 }
 0x28f   :  { %2159 = vrcp.f32 %v883_v38  ;;  %v890_v43 = vadd.f32 1.0, %v2158_v42 }
 0x291   :  { %2161 = vrcp.f32 %v890_v43 }
 0x29c   :  { %v2160_v48 = vpop.eup %2159 }
 0x29d   :  { %v894_v58 = vmul.f32 %v2160_v48, %v893_v53 }
 0x29e   :  { %v2162_v4 = vpop.eup %2161 }
 0x29f   :  { %v895_v45 = vadd.f32 %v894_v58, %v2775_v10  ;;  %v897_v21 = vsub.f32 1.0, %v2162_v4  ;;  %v899_v51 = vmul.f32 %v2162_v4, %v2812_v52 }
 0x2a1   :  { %2163 = vtanh.f32 %v895_v45 }
 0x2ae   :  { %v2164_v44 = vpop.eup %2163 }
 0x2af   :  { %v898_v47 = vmul.f32 %v2164_v44, %v897_v21 }
 0x2b1   :  { %v2856_v0 = vadd.f32 %v899_v51, %v898_v47 }
 0x2b3   :  { %v905_v28 = vpack.c.bf16 %v2856_v0, %v2856_v0 }
 0x2b5   :  { %939 = vmatmul.mubr.bf16.vlgmr.msra.gmra.mxu0 %v905_v28  ;;  %1961 = vmatmul.mubr.bf16.vlgmr.msra.gmra.mxu1 %v905_v28 }
 0x2b6   :  { %1015 = vmatpush1.bf16.msra.mxu0 %v2547_v57  ;;  %1965 = vmatpush3.bf16.msra.mxu1 %v2589_v8 }
 0x2b7   :  { %1016 = vmatprep.subr.bf16.mxu0 %v2553_v59  ;;  %1966 = vmatprep.subr.bf16.mxu1 %v3193_v2 }
 0x2b8   :  { %1046 = vmatprep.mubr.bf16.mxu0 %v3194_v49  ;;  %1980 = vmatprep.mubr.msk.bf16.mxu1 %vm2263_vm3, %v3193_v2 }
 0x2ba   :  { %1017 = vmatpush1.bf16.msra.mxu0 %v2562_v62  ;;  %1967 = vmatpush3.bf16.msra.mxu1 %v2612_v14 }
 0x2bb   :  { %1018 = vmatprep.subr.bf16.mxu0 %v2570_v63  ;;  %1968 = vmatprep.subr.bf16.mxu1 %v3193_v2 }
 0x2be   :  { %1019 = vmatpush1.bf16.msra.mxu0 %v2577_v5  ;;  %1969 = vmatpush3.bf16.msra.mxu1 %v2633_v23 }
 0x2bf   :  { %1020 = vmatprep.subr.bf16.mxu0 %v2584_v7  ;;  %1970 = vmatprep.subr.bf16.mxu1 %v3193_v2 }
 0x2c2   :  { %1021 = vmatpush1.bf16.msra.mxu0 %v2598_v11  ;;  %1971 = vmatpush3.bf16.msra.mxu1 %v2655_v26 }
 0x2c3   :  { %1022 = vmatprep.subr.bf16.mxu0 %v2606_v12  ;;  %1972 = vmatprep.subr.bf16.mxu1 %v3193_v2 }
 0x2c6   :  { %1023 = vmatpush1.bf16.msra.mxu0 %v2620_v19  ;;  %1973 = vmatpush3.bf16.msra.mxu1 %v2674_v32 }
 0x2c7   :  { %1024 = vmatprep.subr.bf16.mxu0 %v2627_v22  ;;  %1974 = vmatprep.subr.bf16.mxu1 %v3193_v2 }
 0x2ca   :  { %1025 = vmatpush1.bf16.msra.mxu0 %v2642_v24  ;;  %1975 = vmatpush3.bf16.msra.mxu1 %v2691_v34 }
 0x2cb   :  { %1026 = vmatprep.subr.bf16.mxu0 %v2649_v25  ;;  %1976 = vmatprep.subr.bf16.mxu1 %v3193_v2 }
 0x2ce   :  { %1027 = vmatpush1.bf16.msra.mxu0 %v2662_v29  ;;  %1977 = vmatpush3.bf16.msra.mxu1 %v2701_v35 }
 0x2cf   :  { %1028 = vmatprep.subr.bf16.mxu0 %v2668_v31  ;;  %1978 = vmatprep.subr.bf16.mxu1 %v3193_v2 }
 0x2d2   :  { %1029 = vmatpush1.bf16.msra.mxu0 %v2683_v33  ;;  %1979 = vmatpush3.bf16.msra.mxu1 %v2712_v36 }
 0x2d3   :  { %1122 = vmatprep.subr.bf16.mxu0 %v2449_v20  ;;  %1984 = vmatprep.subr.bf16.mxu1 %v3193_v2 }
 0x375   :  { %v940_v10 = vpop.f32.mrf.mxu0  ;;  %v981_v41 = vpop.f32.mrf.mxu1 }
 0x376   :  { %v987_v13 = vadd.f32 %v940_v10, %v2760_v54  ;;  %v1001_v44 = vadd.f32 %v2808_v6, %v981_v41 }
 0x377   :  { %v942_v56 = vpop.f32.mrf.mxu0  ;;  %v1962_v61 = vpop.f32.mrf.mxu1 }
 0x378   :  { %v1778_v37 = vmul.f32 -1.442695, %v987_v13  ;;  %v994_v48 = vadd.f32 %v942_v56, %v2765_v60 }
 0x379   :  { %v944_v38 = vpop.f32.mrf.mxu0  ;;  %v984_v42 = vpop.f32.mrf.mxu1 }
 0x37a   :  { %2165 = vpow2.f32 %v1778_v37  ;;  %v1779_v58 = vmul.f32 -1.442695, %v994_v48 }
 0x37b   :  { %v945_v43 = vpop.f32.mrf.mxu0  ;;  %v1963_v53 = vpop.f32.mrf.mxu1 }
 0x37c   :  { %2167 = vpow2.f32 %v1779_v58 }
 0x387   :  { %v2166_v45 = vpop.eup %2165 }
 0x388   :  { %v991_v20 = vadd.f32 1.0, %v2166_v45 }
 0x389   :  { %v2168_v4 = vpop.eup %2167 }
 0x38a   :  { %2169 = vrcp.f32 %v991_v20  ;;  %v998_v21 = vadd.f32 1.0, %v2168_v4 }
 0x38c   :  { %2171 = vrcp.f32 %v998_v21 }
 0x397   :  { %v2170_v54 = vpop.eup %2169 }
 0x398   :  { %v1002_v47 = vmul.f32 %v2170_v54, %v1001_v44 }
 0x399   :  { %v2172_v28 = vpop.eup %2171 }
 0x39a   :  { %v1003_v51 = vadd.f32 %v1002_v47, %v2763_v55  ;;  %v1005_v10 = vsub.f32 1.0, %v2172_v28  ;;  %v1007_v60 = vmul.f32 %v2172_v28, %v2856_v0  ;;  %v2940_v55 = vld [vmem:[%s3177_s4 + $0xac] ss:$12 sps:$4 sm:$0xff]  }
 0x39c   :  { %2173 = vtanh.f32 %v1003_v51 }
 0x3a9   :  { %v2174_v13 = vpop.eup %2173 }
 0x3aa   :  { %v1006_v61 = vmul.f32 %v2174_v13, %v1005_v10 }
 0x3ac   :  { %v2900_v56 = vadd.f32 %v1007_v60, %v1006_v61 }
 0x3ae   :  { %v1013_v37 = vpack.c.bf16 %v2900_v56, %v2900_v56 }
 0x3b0   :  { %1047 = vmatmul.mubr.bf16.vlgmr.msra.gmra.mxu0 %v1013_v37  ;;  %1981 = vmatmul.mubr.bf16.vlgmr.msra.gmra.mxu1 %v1013_v37 }
 0x3b1   :  { %1123 = vmatpush1.bf16.msra.mxu0 %v2547_v57  ;;  %1985 = vmatpush3.bf16.msra.mxu1 %v2589_v8 }
 0x3b2   :  { %1124 = vmatprep.subr.bf16.mxu0 %v2553_v59  ;;  %1986 = vmatprep.subr.bf16.mxu1 %v3193_v2 }
 0x3b3   :  { %1154 = vmatprep.mubr.bf16.mxu0 %v3194_v49  ;;  %2000 = vmatprep.mubr.msk.bf16.mxu1 %vm2263_vm3, %v3193_v2 }
 0x3b5   :  { %1125 = vmatpush1.bf16.msra.mxu0 %v2562_v62  ;;  %1987 = vmatpush3.bf16.msra.mxu1 %v2612_v14 }
 0x3b6   :  { %1126 = vmatprep.subr.bf16.mxu0 %v2570_v63  ;;  %1988 = vmatprep.subr.bf16.mxu1 %v3193_v2 }
 0x3b9   :  { %1127 = vmatpush1.bf16.msra.mxu0 %v2577_v5  ;;  %1989 = vmatpush3.bf16.msra.mxu1 %v2633_v23 }
 0x3ba   :  { %1128 = vmatprep.subr.bf16.mxu0 %v2584_v7  ;;  %1990 = vmatprep.subr.bf16.mxu1 %v3193_v2 }
 0x3bd   :  { %1129 = vmatpush1.bf16.msra.mxu0 %v2598_v11  ;;  %1991 = vmatpush3.bf16.msra.mxu1 %v2655_v26 }
 0x3be   :  { %1130 = vmatprep.subr.bf16.mxu0 %v2606_v12  ;;  %1992 = vmatprep.subr.bf16.mxu1 %v3193_v2 }
 0x3c1   :  { %1131 = vmatpush1.bf16.msra.mxu0 %v2620_v19  ;;  %1993 = vmatpush3.bf16.msra.mxu1 %v2674_v32 }
 0x3c2   :  { %1132 = vmatprep.subr.bf16.mxu0 %v2627_v22  ;;  %1994 = vmatprep.subr.bf16.mxu1 %v3193_v2 }
 0x3c5   :  { %1133 = vmatpush1.bf16.msra.mxu0 %v2642_v24  ;;  %1995 = vmatpush3.bf16.msra.mxu1 %v2691_v34 }
 0x3c6   :  { %1134 = vmatprep.subr.bf16.mxu0 %v2649_v25  ;;  %1996 = vmatprep.subr.bf16.mxu1 %v3193_v2 }
 0x3c9   :  { %1135 = vmatpush1.bf16.msra.mxu0 %v2662_v29  ;;  %1997 = vmatpush3.bf16.msra.mxu1 %v2701_v35 }
 0x3ca   :  { %1136 = vmatprep.subr.bf16.mxu0 %v2668_v31  ;;  %1998 = vmatprep.subr.bf16.mxu1 %v3193_v2 }
 0x3cd   :  { %1137 = vmatpush1.bf16.msra.mxu0 %v2683_v33  ;;  %1999 = vmatpush3.bf16.msra.mxu1 %v2712_v36 }
 0x3ce   :  { %1230 = vmatprep.subr.bf16.mxu0 %v2940_v55  ;;  %2004 = vmatprep.subr.bf16.mxu1 %v3193_v2 }
 0x470   :  { %v1048_v41 = vpop.f32.mrf.mxu0  ;;  %v1089_v38 = vpop.f32.mrf.mxu1 }
 0x471   :  { %v1095_v42 = vadd.f32 %v1048_v41, %v2767_v1  ;;  %v1109_v10 = vadd.f32 %v2808_v6, %v1089_v38 }
 0x472   :  { %v1050_v43 = vpop.f32.mrf.mxu0  ;;  %v1982_v53 = vpop.f32.mrf.mxu1 }
 0x473   :  { %v1780_v48 = vmul.f32 -1.442695, %v1095_v42  ;;  %v1102_v21 = vadd.f32 %v1050_v43, %v2772_v9 }
 0x474   :  { %v1052_v58 = vpop.f32.mrf.mxu0  ;;  %v1092_v45 = vpop.f32.mrf.mxu1 }
 0x475   :  { %2175 = vpow2.f32 %v1780_v48  ;;  %v1781_v44 = vmul.f32 -1.442695, %v1102_v21 }
 0x476   :  { %v1053_v20 = vpop.f32.mrf.mxu0  ;;  %v1983_v4 = vpop.f32.mrf.mxu1 }
 0x477   :  { %2177 = vpow2.f32 %v1781_v44 }
 0x482   :  { %v2176_v54 = vpop.eup %2175 }
 0x483   :  { %v1099_v47 = vadd.f32 1.0, %v2176_v54 }
 0x484   :  { %v2178_v51 = vpop.eup %2177 }
 0x485   :  { %2179 = vrcp.f32 %v1099_v47  ;;  %v1106_v28 = vadd.f32 1.0, %v2178_v51 }
 0x487   :  { %2181 = vrcp.f32 %v1106_v28 }
 0x492   :  { %v2180_v1 = vpop.eup %2179 }
 0x493   :  { %v1110_v13 = vmul.f32 %v2180_v1, %v1109_v10 }
 0x494   :  { %v2182_v60 = vpop.eup %2181 }
 0x495   :  { %v1111_v61 = vadd.f32 %v1110_v13, %v2770_v3  ;;  %v1113_v37 = vsub.f32 1.0, %v2182_v60  ;;  %v1115_v9 = vmul.f32 %v2182_v60, %v2900_v56 }
 0x497   :  { %2183 = vtanh.f32 %v1111_v61 }
 0x4a4   :  { %v2184_v41 = vpop.eup %2183 }
 0x4a5   :  { %v1114_v42 = vmul.f32 %v2184_v41, %v1113_v37 }
 0x4a7   :  { %v2949_v43 = vadd.f32 %v1115_v9, %v1114_v42 }
 0x4a9   :  { %v1121_v53 = vpack.c.bf16 %v2949_v43, %v2949_v43 }
 0x4ab   :  { %1155 = vmatmul.mubr.bf16.vlgmr.msra.gmra.mxu0 %v1121_v53  ;;  %2001 = vmatmul.mubr.bf16.vlgmr.msra.gmra.mxu1 %v1121_v53 }
 0x4ac   :  { %1231 = vmatpush1.bf16.msra.mxu0 %v2547_v57  ;;  %2005 = vmatpush3.bf16.msra.mxu1 %v2589_v8 }
 0x4ad   :  { %1232 = vmatprep.subr.bf16.mxu0 %v2553_v59  ;;  %2006 = vmatprep.subr.bf16.mxu1 %v3193_v2 }
 0x4ae   :  { %1262 = vmatprep.mubr.bf16.mxu0 %v3194_v49  ;;  %2020 = vmatprep.mubr.msk.bf16.mxu1 %vm2263_vm3, %v3193_v2 }
 0x4b0   :  { %1233 = vmatpush1.bf16.msra.mxu0 %v2562_v62  ;;  %2007 = vmatpush3.bf16.msra.mxu1 %v2612_v14 }
 0x4b1   :  { %1234 = vmatprep.subr.bf16.mxu0 %v2570_v63  ;;  %2008 = vmatprep.subr.bf16.mxu1 %v3193_v2 }
 0x4b4   :  { %1235 = vmatpush1.bf16.msra.mxu0 %v2577_v5  ;;  %2009 = vmatpush3.bf16.msra.mxu1 %v2633_v23 }
 0x4b5   :  { %1236 = vmatprep.subr.bf16.mxu0 %v2584_v7  ;;  %2010 = vmatprep.subr.bf16.mxu1 %v3193_v2 }
 0x4b8   :  { %1237 = vmatpush1.bf16.msra.mxu0 %v2598_v11  ;;  %2011 = vmatpush3.bf16.msra.mxu1 %v2655_v26 }
 0x4b9   :  { %1238 = vmatprep.subr.bf16.mxu0 %v2606_v12  ;;  %2012 = vmatprep.subr.bf16.mxu1 %v3193_v2 }
 0x4bc   :  { %1239 = vmatpush1.bf16.msra.mxu0 %v2620_v19  ;;  %2013 = vmatpush3.bf16.msra.mxu1 %v2674_v32 }
 0x4bd   :  { %1240 = vmatprep.subr.bf16.mxu0 %v2627_v22  ;;  %2014 = vmatprep.subr.bf16.mxu1 %v3193_v2 }
 0x4c0   :  { %1241 = vmatpush1.bf16.msra.mxu0 %v2642_v24  ;;  %2015 = vmatpush3.bf16.msra.mxu1 %v2691_v34 }
 0x4c1   :  { %1242 = vmatprep.subr.bf16.mxu0 %v2649_v25  ;;  %2016 = vmatprep.subr.bf16.mxu1 %v3193_v2 }
 0x4c4   :  { %1243 = vmatpush1.bf16.msra.mxu0 %v2662_v29  ;;  %2017 = vmatpush3.bf16.msra.mxu1 %v2701_v35 }
 0x4c5   :  { %1244 = vmatprep.subr.bf16.mxu0 %v2668_v31  ;;  %2018 = vmatprep.subr.bf16.mxu1 %v3193_v2 }
 0x4c8   :  { %1245 = vmatpush1.bf16.msra.mxu0 %v2683_v33  ;;  %2019 = vmatpush3.bf16.msra.mxu1 %v2712_v36 }
 0x4c9   :  { %1338 = vmatprep.subr.bf16.mxu0 %v2940_v55  ;;  %2024 = vmatprep.subr.bf16.mxu1 %v3193_v2 }
 0x56b   :  { %v1156_v3 = vpop.f32.mrf.mxu0  ;;  %v1197_v38 = vpop.f32.mrf.mxu1 }
 0x56c   :  { %v1203_v48 = vadd.f32 %v1156_v3, %v2777_v16  ;;  %v1217_v61 = vadd.f32 %v2808_v6, %v1197_v38 }
 0x56d   :  { %v1158_v58 = vpop.f32.mrf.mxu0  ;;  %v2002_v45 = vpop.f32.mrf.mxu1 }
 0x56e   :  { %v1782_v20 = vmul.f32 -1.442695, %v1203_v48  ;;  %v1210_v47 = vadd.f32 %v1158_v58, %v2779_v18 }
 0x56f   :  { %v1160_v4 = vpop.f32.mrf.mxu0  ;;  %v1200_v21 = vpop.f32.mrf.mxu1 }
 0x570   :  { %2185 = vpow2.f32 %v1782_v20  ;;  %v1783_v51 = vmul.f32 -1.442695, %v1210_v47  ;;  %v2226_v4 = vld [vmem:[%s3177_s4 + $0xa8] ss:$12 sps:$4 sm:$0xff]  }
 0x571   :  { %v1161_v44 = vpop.f32.mrf.mxu0  ;;  %v2003_v54 = vpop.f32.mrf.mxu1  ;;  %v2228_v21 = vld [vmem:[%s3177_s4 + $0x94] ss:$12 sps:$4 sm:$0xff]   ;;  %v2231_v47 = vld [vmem:[%s3177_s4 + $0x7c] ss:$12 sps:$4 sm:$0xff]  }
 0x572   :  { %2187 = vpow2.f32 %v1783_v51  ;;  %v2229_v44 = vld [vmem:[%s3177_s4 + $0x90] ss:$12 sps:$4 sm:$0xff]   ;;  %v2230_v54 = vld [vmem:[%s3177_s4 + $0x98] ss:$12 sps:$4 sm:$0xff]   ;;  %v2233_v51 = vld [vmem:[%s3177_s4 + $0x80] ss:$12 sps:$4 sm:$0xff]  }
 0x57d   :  { %v2186_v28 = vpop.eup %2185 }
 0x57e   :  { %v1207_v10 = vadd.f32 1.0, %v2186_v28  ;;  %v2234_v28 = vld [vmem:[%s3177_s4 + $0x64] ss:$12 sps:$4 sm:$0xff]  }
 0x57f   :  { %v2188_v1 = vpop.eup %2187 }
 0x580   :  { %2189 = vrcp.f32 %v1207_v10  ;;  %v1214_v13 = vadd.f32 1.0, %v2188_v1  ;;  %v2235_v10 = vld [vmem:[%s3177_s4 + $0x60] ss:$12 sps:$4 sm:$0xff]   ;;  %v2236_v1 = vld [vmem:[%s3177_s4 + $0x68] ss:$12 sps:$4 sm:$0xff]  }
 0x582   :  { %2191 = vrcp.f32 %v1214_v13  ;;  %v2237_v13 = vld [vmem:[%s3177_s4 + $0x4c] ss:$12 sps:$4 sm:$0xff]  }
 0x58d   :  { %v2190_v16 = vpop.eup %2189 }
 0x58e   :  { %v1218_v60 = vmul.f32 %v2190_v16, %v1217_v61  ;;  %v2238_v61 = vld [vmem:[%s3177_s4 + $0x48] ss:$12 sps:$4 sm:$0xff]  }
 0x58f   :  { %v2192_v41 = vpop.eup %2191  ;;  %v2239_v16 = vld [vmem:[%s3177_s4 + $0x34] ss:$12 sps:$4 sm:$0xff]  }
 0x590   :  { %v1219_v37 = vadd.f32 %v1218_v60, %v2793_v50  ;;  %v1221_v42 = vsub.f32 1.0, %v2192_v41  ;;  %v1223_v18 = vmul.f32 %v2192_v41, %v2949_v43  ;;  %v2240_v60 = vld [vmem:[%s3177_s4 + $0x30] ss:$12 sps:$4 sm:$0xff]  }
 0x591   :  { %v2243_v41 = vld [vmem:[%s3177_s4 + $0x4] ss:$12 sps:$4 sm:$0xff]  }
 0x592   :  { %2193 = vtanh.f32 %v1219_v37  ;;  %v2241_v37 = vld [vmem:[%s3177_s4 + $0x1c] ss:$12 sps:$4 sm:$0xff]  }
 0x59f   :  { %v2194_v9 = vpop.eup %2193 }
 0x5a0   :  { %v1222_v53 = vmul.f32 %v2194_v9, %v1221_v42 }
 0x5a2   :  { %v2993_v3 = vadd.f32 %v1223_v18, %v1222_v53 }
 0x5a4   :  { %v1229_v48 = vpack.c.bf16 %v2993_v3, %v2993_v3 }
 0x5a6   :  { %1263 = vmatmul.mubr.bf16.vlgmr.msra.gmra.mxu0 %v1229_v48  ;;  %2021 = vmatmul.mubr.bf16.vlgmr.msra.gmra.mxu1 %v1229_v48 }
 0x5a7   :  { %1339 = vmatpush1.bf16.msra.mxu0 %v2547_v57  ;;  %2025 = vmatpush3.bf16.msra.mxu1 %v2589_v8 }
 0x5a8   :  { %1340 = vmatprep.subr.bf16.mxu0 %v2553_v59  ;;  %2026 = vmatprep.subr.bf16.mxu1 %v3193_v2 }
 0x5a9   :  { %1370 = vmatprep.mubr.bf16.mxu0 %v3194_v49  ;;  %2040 = vmatprep.mubr.msk.bf16.mxu1 %vm2263_vm3, %v3193_v2 }
 0x5ab   :  { %1341 = vmatpush1.bf16.msra.mxu0 %v2562_v62  ;;  %2027 = vmatpush3.bf16.msra.mxu1 %v2612_v14 }
 0x5ac   :  { %1342 = vmatprep.subr.bf16.mxu0 %v2570_v63  ;;  %2028 = vmatprep.subr.bf16.mxu1 %v3193_v2 }
 0x5af   :  { %1343 = vmatpush1.bf16.msra.mxu0 %v2577_v5  ;;  %2029 = vmatpush3.bf16.msra.mxu1 %v2633_v23 }
 0x5b0   :  { %1344 = vmatprep.subr.bf16.mxu0 %v2584_v7  ;;  %2030 = vmatprep.subr.bf16.mxu1 %v3193_v2 }
 0x5b3   :  { %1345 = vmatpush1.bf16.msra.mxu0 %v2598_v11  ;;  %2031 = vmatpush3.bf16.msra.mxu1 %v2655_v26 }
 0x5b4   :  { %1346 = vmatprep.subr.bf16.mxu0 %v2606_v12  ;;  %2032 = vmatprep.subr.bf16.mxu1 %v3193_v2 }
 0x5b7   :  { %1347 = vmatpush1.bf16.msra.mxu0 %v2620_v19  ;;  %2033 = vmatpush3.bf16.msra.mxu1 %v2674_v32 }
 0x5b8   :  { %1348 = vmatprep.subr.bf16.mxu0 %v2627_v22  ;;  %2034 = vmatprep.subr.bf16.mxu1 %v3193_v2 }
 0x5bb   :  { %1349 = vmatpush1.bf16.msra.mxu0 %v2642_v24  ;;  %2035 = vmatpush3.bf16.msra.mxu1 %v2691_v34 }
 0x5bc   :  { %1350 = vmatprep.subr.bf16.mxu0 %v2649_v25  ;;  %2036 = vmatprep.subr.bf16.mxu1 %v3193_v2 }
 0x5bf   :  { %1351 = vmatpush1.bf16.msra.mxu0 %v2662_v29  ;;  %2037 = vmatpush3.bf16.msra.mxu1 %v2701_v35 }
 0x5c0   :  { %1352 = vmatprep.subr.bf16.mxu0 %v2668_v31  ;;  %2038 = vmatprep.subr.bf16.mxu1 %v3193_v2 }
 0x5c3   :  { %1353 = vmatpush1.bf16.msra.mxu0 %v2683_v33  ;;  %2039 = vmatpush3.bf16.msra.mxu1 %v2712_v36 }
 0x5c4   :  { %1446 = vmatprep.subr.bf16.mxu0 %v2940_v55  ;;  %2044 = vmatprep.subr.bf16.mxu1 %v3193_v2 }
 0x666   :  { %v1264_v57 = vpop.f32.mrf.mxu0  ;;  %v1305_v59 = vpop.f32.mrf.mxu1 }
 0x667   :  { %v1311_v62 = vadd.f32 %v1264_v57, %v2781_v27  ;;  %v1325_v29 = vadd.f32 %v2808_v6, %v1305_v59 }
 0x668   :  { %v1266_v63 = vpop.f32.mrf.mxu0  ;;  %v2022_v5 = vpop.f32.mrf.mxu1 }
 0x669   :  { %v1784_v7 = vmul.f32 -1.442695, %v1311_v62  ;;  %v1318_v19 = vadd.f32 %v1266_v63, %v2783_v30 }
 0x66a   :  { %v1268_v8 = vpop.f32.mrf.mxu0  ;;  %v1308_v11 = vpop.f32.mrf.mxu1 }
 0x66b   :  { %2195 = vpow2.f32 %v1784_v7  ;;  %v1785_v22 = vmul.f32 -1.442695, %v1318_v19 }
 0x66c   :  { %v1269_v12 = vpop.f32.mrf.mxu0  ;;  %v2023_v14 = vpop.f32.mrf.mxu1 }
 0x66d   :  { %2197 = vpow2.f32 %v1785_v22 }
 0x678   :  { %v2196_v23 = vpop.eup %2195 }
 0x679   :  { %v1315_v24 = vadd.f32 1.0, %v2196_v23 }
 0x67a   :  { %v2198_v25 = vpop.eup %2197 }
 0x67b   :  { %2199 = vrcp.f32 %v1315_v24  ;;  %v1322_v26 = vadd.f32 1.0, %v2198_v25 }
 0x67d   :  { %2201 = vrcp.f32 %v1322_v26 }
 0x688   :  { %v2200_v31 = vpop.eup %2199 }
 0x689   :  { %v1326_v33 = vmul.f32 %v2200_v31, %v1325_v29 }
 0x68a   :  { %v2202_v50 = vpop.eup %2201 }
 0x68b   :  { %v1327_v27 = vadd.f32 %v1326_v33, %v2803_v17  ;;  %v1329_v55 = vsub.f32 1.0, %v2202_v50  ;;  %v1331_v30 = vmul.f32 %v2202_v50, %v2993_v3  ;;  %v2227_v17 = vld [vmem:[%s3177_s4 + $0xb0] ss:$12 sps:$4 sm:$0xff]   ;;  %v2140_v50 = vld [vmem:[%s3179_s6 + $0x20] sm:$0xff]  }
 0x68c   :  { %v2138_v33 = vld [vmem:[%s3179_s6 + $0x30] sm:$0xff]  }
 0x68d   :  { %2203 = vtanh.f32 %v1327_v27  ;;  %v2139_v27 = vld [vmem:[%s3179_s6 + $0x28] sm:$0xff]  }
 0x69a   :  { %v2204_v38 = vpop.eup %2203 }
 0x69b   :  { %v1330_v58 = vmul.f32 %v2204_v38, %v1329_v55  ;;  %v2141_v55 = vld [vmem:[%s3179_s6 + $0x18] sm:$0xff]   ;;  %v2142_v38 = vld [vmem:[%s3179_s6 + $0x10] sm:$0xff]  }
 0x69d   :  { %v3037_v45 = vadd.f32 %v1331_v30, %v1330_v58  ;;  %v2143_v58 = vld [vmem:[%s3179_s6 + $0x8] sm:$0xff]   ;;  %v2144_v30 = vld [vmem:[%s3179_s6] sm:$0xff]  }
 0x69f   :  { %v1337_v20 = vpack.c.bf16 %v3037_v45, %v3037_v45 }
 0x6a1   :  { %1371 = vmatmul.mubr.bf16.vlgmr.msra.gmra.mxu0 %v1337_v20  ;;  %2041 = vmatmul.mubr.bf16.vlgmr.msra.gmra.mxu1 %v1337_v20 }
 0x6a2   :  { %1447 = vmatpush1.bf16.msra.mxu0 %v2226_v4  ;;  %2045 = vmatpush3.bf16.msra.mxu1 %v2227_v17  ;;  %v3195_v17 = vld [vmem:[#allocation7_spill] sm:$0xff] }
 0x6a3   :  { %1448 = vmatprep.subr.bf16.mxu0 %v2228_v21  ;;  %2046 = vmatprep.subr.bf16.mxu1 %v3193_v2 }
 0x6a4   :  { %1478 = vmatprep.mubr.bf16.mxu0 %v3194_v49  ;;  %2060 = vmatprep.mubr.msk.bf16.mxu1 %vm2263_vm3, %v3193_v2  ;;  %v2232_v49 = vld [vmem:[%s3177_s4 + $0x78] ss:$12 sps:$4 sm:$0xff]  }
 0x6a6   :  { %1449 = vmatpush1.bf16.msra.mxu0 %v2229_v44  ;;  %2047 = vmatpush3.bf16.msra.mxu1 %v2230_v54 }
 0x6a7   :  { %1450 = vmatprep.subr.bf16.mxu0 %v2231_v47  ;;  %2048 = vmatprep.subr.bf16.mxu1 %v3193_v2 }
 0x6aa   :  { %1451 = vmatpush1.bf16.msra.mxu0 %v2232_v49  ;;  %2049 = vmatpush3.bf16.msra.mxu1 %v2233_v51 }
 0x6ab   :  { %1452 = vmatprep.subr.bf16.mxu0 %v2234_v28  ;;  %2050 = vmatprep.subr.bf16.mxu1 %v3193_v2 }
 0x6ae   :  { %1453 = vmatpush1.bf16.msra.mxu0 %v2235_v10  ;;  %2051 = vmatpush3.bf16.msra.mxu1 %v2236_v1 }
 0x6af   :  { %1454 = vmatprep.subr.bf16.mxu0 %v2237_v13  ;;  %2052 = vmatprep.subr.bf16.mxu1 %v3193_v2 }
 0x6b2   :  { %1455 = vmatpush1.bf16.msra.mxu0 %v2238_v61  ;;  %2053 = vmatpush3.bf16.msra.mxu1 %v2674_v32  ;;  %v2242_v32 = vld [vmem:[%s3177_s4 + $0x18] ss:$12 sps:$4 sm:$0xff]  }
 0x6b3   :  { %1456 = vmatprep.subr.bf16.mxu0 %v2239_v16  ;;  %2054 = vmatprep.subr.bf16.mxu1 %v3193_v2 }
 0x6b6   :  { %1457 = vmatpush1.bf16.msra.mxu0 %v2240_v60  ;;  %2055 = vmatpush3.bf16.msra.mxu1 %v2691_v34  ;;  %v2244_v34 = vld [vmem:[%s3177_s4] ss:$12 sps:$4 sm:$0xff]  }
 0x6b7   :  { %1458 = vmatprep.subr.bf16.mxu0 %v2241_v37  ;;  %2056 = vmatprep.subr.bf16.mxu1 %v3193_v2 }
 0x6ba   :  { %1459 = vmatpush1.bf16.msra.mxu0 %v2242_v32  ;;  %2057 = vmatpush3.bf16.msra.mxu1 %v2701_v35 }
 0x6bb   :  { %1460 = vmatprep.subr.bf16.mxu0 %v2243_v41  ;;  %2058 = vmatprep.subr.bf16.mxu1 %v3193_v2 }
 0x6be   :  { %1461 = vmatpush1.bf16.msra.mxu0 %v2244_v34  ;;  %2059 = vmatpush3.bf16.msra.mxu1 %v2712_v36  ;;  %v3196_v34 = vld [vmem:[#allocation8_spill] sm:$0xff] }
 0x6bf   :  { %2064 = vmatprep.subr.bf16.mxu0 %v3193_v2 }
 0x761   :  { %v1372_v42 = vpop.f32.mrf.mxu0  ;;  %v1413_v9 = vpop.f32.mrf.mxu1 }
 0x762   :  { %v1419_v35 = vadd.f32 %v1372_v42, %v2785_v39  ;;  %v1433_v14 = vadd.f32 %v2808_v6, %v1413_v9  ;;  %v793_v9 = vmax.f32 %v2812_v52, -1e+30 }
 0x763   :  { %v1374_v53 = vpop.f32.mrf.mxu0  ;;  %v2042_v18 = vpop.f32.mrf.mxu1 }
 0x764   :  { %v1786_v48 = vmul.f32 -1.442695, %v1419_v35  ;;  %v1426_v5 = vadd.f32 %v1374_v53, %v2790_v46  ;;  %v901_v35 = vmax.f32 %v793_v9, %v2856_v0  ;;  %v1790_v0 = vld [vmem:[%s3197_s3] ss:$0 sm:$0xff] }
 0x765   :  { %v1376_v57 = vpop.f32.mrf.mxu0  ;;  %v1416_v59 = vpop.f32.mrf.mxu1 }
 0x766   :  { %2205 = vpow2.f32 %v1786_v48  ;;  %v1787_v7 = vmul.f32 -1.442695, %v1426_v5 }
 0x767   :  { %v1377_v62 = vpop.f32.mrf.mxu0  ;;  %v2043_v63 = vpop.f32.mrf.mxu1 }
 0x768   :  { %2207 = vpow2.f32 %v1787_v7 }
 0x773   :  { %v2206_v8 = vpop.eup %2205 }
 0x774   :  { %v1423_v36 = vadd.f32 1.0, %v2206_v8 }
 0x775   :  { %v2208_v11 = vpop.eup %2207 }
 0x776   :  { %2209 = vrcp.f32 %v1423_v36  ;;  %v1430_v12 = vadd.f32 1.0, %v2208_v11 }
 0x778   :  { %2211 = vrcp.f32 %v1430_v12 }
 0x783   :  { %v2210_v39 = vpop.eup %2209 }
 0x784   :  { %v1434_v19 = vmul.f32 %v2210_v39, %v1433_v14 }
 0x785   :  { %v2212_v23 = vpop.eup %2211 }
 0x786   :  { %v1435_v22 = vadd.f32 %v1434_v19, %v2788_v40  ;;  %v1437_v24 = vsub.f32 1.0, %v2212_v23  ;;  %v1439_v46 = vmul.f32 %v2212_v23, %v3037_v45  ;;  %v2137_v40 = vld [vmem:[%s3179_s6 + $0x38] sm:$0xff]  }
 0x788   :  { %2213 = vtanh.f32 %v1435_v22 }
 0x795   :  { %v2214_v25 = vpop.eup %2213 }
 0x796   :  { %v1438_v26 = vmul.f32 %v2214_v25, %v1437_v24 }
 0x798   :  { %v3118_v29 = vadd.f32 %v1439_v46, %v1438_v26 }
 0x79a   :  { %v1445_v31 = vpack.c.bf16 %v3118_v29, %v3118_v29 }
 0x79c   :  { %1479 = vmatmul.mubr.bf16.vlgmr.msra.gmra.mxu0 %v1445_v31  ;;  %2061 = vmatmul.mubr.bf16.vlgmr.msra.gmra.mxu1 %v1445_v31 }
 0x79d   :  { %2080 = vmatprep.mubr.msk.bf16.mxu0 %vm2263_vm3, %v3193_v2  ;;  %2065 = vmatpush3.bf16.msra.mxu0 %v2137_v40 }
 0x79e   :  { %2066 = vmatprep.subr.bf16.mxu0 %v3193_v2 }
 0x7a1   :  { %2067 = vmatpush3.bf16.msra.mxu0 %v2138_v33 }
 0x7a2   :  { %2068 = vmatprep.subr.bf16.mxu0 %v3193_v2 }
 0x7a5   :  { %2069 = vmatpush3.bf16.msra.mxu0 %v2139_v27 }
 0x7a6   :  { %2070 = vmatprep.subr.bf16.mxu0 %v3193_v2 }
 0x7a9   :  { %2071 = vmatpush3.bf16.msra.mxu0 %v2140_v50 }
 0x7aa   :  { %2072 = vmatprep.subr.bf16.mxu0 %v3193_v2 }
 0x7ad   :  { %2073 = vmatpush3.bf16.msra.mxu0 %v2141_v55 }
 0x7ae   :  { %2074 = vmatprep.subr.bf16.mxu0 %v3193_v2 }
 0x7b1   :  { %2075 = vmatpush3.bf16.msra.mxu0 %v2142_v38 }
 0x7b2   :  { %2076 = vmatprep.subr.bf16.mxu0 %v3193_v2 }
 0x7b5   :  { %2077 = vmatpush3.bf16.msra.mxu0 %v2143_v58 }
 0x7b6   :  { %2078 = vmatprep.subr.bf16.mxu0 %v3193_v2 }
 0x7b9   :  { %2079 = vmatpush3.bf16.msra.mxu0 %v2144_v30 }
 0x85c   :  { %v1480_v20 = vpop.f32.mrf.mxu0  ;;  %v1521_v4 = vpop.f32.mrf.mxu1 }
 0x85d   :  { %v1527_v21 = vadd.f32 %v1480_v20, %v3195_v17  ;;  %v1541_v37 = vadd.f32 %v2808_v6, %v1521_v4 }
 0x85e   :  { %v1482_v44 = vpop.f32.mrf.mxu0  ;;  %v2062_v54 = vpop.f32.mrf.mxu1 }
 0x85f   :  { %v1788_v47 = vmul.f32 -1.442695, %v1527_v21  ;;  %v1534_v1 = vadd.f32 %v1482_v44, %v2800_v15  ;;  %v1009_v15 = vmax.f32 %v901_v35, %v2900_v56 }
 0x860   :  { %v1484_v49 = vpop.f32.mrf.mxu0  ;;  %v1524_v51 = vpop.f32.mrf.mxu1 }
 0x861   :  { %2215 = vpow2.f32 %v1788_v47  ;;  %v1789_v13 = vmul.f32 -1.442695, %v1534_v1  ;;  %v1117_v18 = vmax.f32 %v1009_v15, %v2949_v43 }
 0x862   :  { %v1485_v28 = vpop.f32.mrf.mxu0  ;;  %v2063_v10 = vpop.f32.mrf.mxu1 }
 0x863   :  { %2217 = vpow2.f32 %v1789_v13  ;;  %v1225_v48 = vmax.f32 %v1117_v18, %v2993_v3 }
 0x865   :  { %v1333_v6 = vmax.f32 %v1225_v48, %v3037_v45 }
 0x867   :  { %v1441_v5 = vmax.f32 %v1333_v6, %v3118_v29 }
 0x86e   :  { %v2216_v61 = vpop.eup %2215 }
 0x86f   :  { %v1531_v16 = vadd.f32 1.0, %v2216_v61 }
 0x870   :  { %v2218_v2 = vpop.eup %2217 }
 0x871   :  { %2219 = vrcp.f32 %v1531_v16  ;;  %v1538_v60 = vadd.f32 1.0, %v2218_v2 }
 0x873   :  { %2221 = vrcp.f32 %v1538_v60 }
 0x87e   :  { %v2220_v32 = vpop.eup %2219 }
 0x87f   :  { %v1542_v41 = vmul.f32 %v2220_v32, %v1541_v37 }
 0x880   :  { %v2222_v53 = vpop.eup %2221 }
 0x881   :  { %v1543_v42 = vadd.f32 %v1542_v41, %v3196_v34  ;;  %v1545_v57 = vsub.f32 1.0, %v2222_v53  ;;  %v1547_v63 = vmul.f32 %v2222_v53, %v3118_v29 }
 0x883   :  { %2223 = vtanh.f32 %v1543_v42 }
 0x890   :  { %v2224_v59 = vpop.eup %2223 }
 0x891   :  { %v1546_v62 = vmul.f32 %v2224_v59, %v1545_v57 }
 0x893   :  { %v1548_v7 = vadd.f32 %v1547_v63, %v1546_v62 }
 0x895   :  { %v1549_v52 = vmax.f32 %v1441_v5, %v1548_v7 }
 0x897   :  { %v1550_v8 = vpack.c.bf16 %v1549_v52, %v1549_v52 }
 0x899   :  { %2081 = vmatmul.mubr.bf16.vlgmr.msra.gmra.mxu0 %v1550_v8 }
 0x959   :  { %v1656_v56 = vpop.f32.mrf.mxu0 }
 0x95a   :  { %v1657_v43 = vadd.f32 %v1790_v0, %v1656_v56 }
 0x95b   :  { %v2082_v3 = vpop.f32.mrf.mxu0 }
 0x95c   :  { %1662 = vst [vmem:[%s3198_s17] sm:$0xff] %v1657_v43 }
 0x95d   :  { %v1659_v45 = vpop.f32.mrf.mxu0 }
 0x95f   :  { %v2083_v36 = vpop.f32.mrf.mxu0 }

</bundles_post_ra>
